<compile_context>
chip_gen: v7x
topology: tpu7x:2x2x1
jax: 0.10.0
libtpu: 0.0.40
codegen_flags: <defaults>
</compile_context>

<pallas_src>
import functools
import math

import jax
import jax.numpy as jnp
from jax import lax
from jax.experimental import pallas as pl
from jax.experimental.pallas import tpu as pltpu

_MIB = 1024 * 1024


def _round_up(x: int, n: int) -> int:
    return ((x + n - 1) // n) * n


def _cdiv(a: int, b: int) -> int:
    return (a + b - 1) // b


def _tpu_vmem_capacity_bytes() -> int:
    """Per-TensorCore VMEM capacity; conservative 64 MiB (v7x) fallback."""
    try:
        info = pltpu.get_tpu_info()
        for name in ("vmem_capacity_bytes", "vmem_bytes", "vmem_size_bytes"):
            v = getattr(info, name, None)
            if v:
                return int(v)
    except Exception:
        pass
    return 64 * _MIB


def _num_tensorcores() -> int:
    """TensorCores sharing the 'parallel' grid axis (2 on v7x, else 1)."""
    try:
        d = jax.devices()[0]
        for name in ("num_cores", "core_count", "num_cores_per_chip"):
            v = getattr(d, name, None)
            if isinstance(v, int) and v > 0:
                return v
    except Exception:
        pass
    return 1


def _pick_block_m(m: int, requested: int, num_cores: int) -> int:
    """Row-tile size: one full-M step for small M (no forced splitting on
    single-TC chips), 2-way split only when >=2 TCs and each still gets >=128
    rows, otherwise clamp to `requested` for large M."""
    sub = 16  # multiple of both the f32 (8) and bf16 (16) sublane tiles
    requested = max(sub, (requested // sub) * sub)
    m_up = _round_up(m, sub)
    if m_up <= requested:
        if num_cores >= 2 and m >= 256:
            per_core = _round_up(_cdiv(m, num_cores), sub)
            if per_core >= 128:
                return per_core
        return m_up
    return requested


def _gelu(h, approximate: bool):
    if approximate:
        # tanh GELU: transcendental goes to the EUP slot (free alongside
        # MXU/VPU) and roughly halves the VPU polynomial work vs erf.
        c = jnp.float32(math.sqrt(2.0 / math.pi))
        return 0.5 * h * (1.0 + jnp.tanh(c * (h + 0.044715 * h * h * h)))
    # Exact GELU (PyTorch nn.GELU default, approximate='none'); validation path.
    return 0.5 * h * (1.0 + lax.erf(h * jnp.float32(1.0 / math.sqrt(2.0))))


def _mlp_kernel(x_ref, w1_ref, b1_ref, w2_ref, b2_ref, o_ref, *,
                approximate_gelu: bool, hidden_chunk: int):
    # x_ref: (TM, E) input dtype | w1_ref: (E, H) | b1_ref: (1, H) f32
    # w2_ref: (H, E)             | b2_ref: (1, E) f32 | o_ref: (TM, E)
    cdtype = w1_ref.dtype
    x = x_ref[...].astype(cdtype)          # in-kernel cast: x read once from HBM
    tm = x.shape[0]
    hidden = w1_ref.shape[1]
    emb = w2_ref.shape[1]

    acc = jnp.zeros((tm, emb), jnp.float32)
    # Static loop over aligned H chunks: keeps the live f32 intermediate small
    # and interleaves VPU GELU with MXU matmul work.
    for c in range(hidden // hidden_chunk):
        lo = c * hidden_chunk
        hi = lo + hidden_chunk
        h = jnp.dot(x, w1_ref[:, lo:hi], preferred_element_type=jnp.float32)
        h = _gelu(h + b1_ref[:, lo:hi], approximate_gelu)
        acc = acc + jnp.dot(h.astype(cdtype), w2_ref[lo:hi, :],
                            preferred_element_type=jnp.float32)
    o_ref[...] = (acc + b2_ref[...]).astype(o_ref.dtype)


@functools.partial(
    jax.jit,
    static_argnames=("block_m", "approximate_gelu", "hidden_chunk", "out_dtype"))
def mlp_forward(x, w1, b1, w2, b2, *, block_m=512, approximate_gelu=True,
                hidden_chunk=None, out_dtype=None):
    """Fused MLP forward: y = GELU(x @ w1 + b1) @ w2 + b2.

    x:  (..., emb_dim)          any float dtype (cast to weight dtype in-kernel)
    w1: (emb_dim, hidden_dim)   matmul dtype; use prepare_mlp_params() to make
                                these bf16 ONCE for the fast path
    b1: (hidden_dim,)           f32 (bias-add happens in f32)
    w2: (hidden_dim, emb_dim)
    b2: (emb_dim,)              f32

    Note: approximate_gelu=True (tanh) is the fast default and differs slightly
    from PyTorch nn.GELU(approximate='none'); pass False for the exact erf.
    """
    emb_dim = x.shape[-1]
    hidden_dim = w1.shape[-1]
    lead_shape = x.shape[:-1]
    out_dtype = x.dtype if out_dtype is None else out_dtype

    x2d = x.reshape(-1, emb_dim)            # no pad, no cast, no output slice
    m = x2d.shape[0]
    b1_2d = b1.reshape(1, hidden_dim).astype(jnp.float32)
    b2_2d = b2.reshape(1, emb_dim).astype(jnp.float32)

    if hidden_chunk is None:
        hidden_chunk = 256 if (hidden_dim % 256 == 0 and hidden_dim > 256) else hidden_dim
    if hidden_dim % hidden_chunk != 0 or hidden_chunk % 128 != 0:
        hidden_chunk = hidden_dim

    bm = _pick_block_m(m, block_m, _num_tensorcores())
    grid = (_cdiv(m, bm),)                  # ragged last M block masked by Pallas

    # ---- VMEM budget (per TensorCore; weights resident, single-buffered). ----
    w_bytes = jnp.dtype(w1.dtype).itemsize
    x_bytes = jnp.dtype(x2d.dtype).itemsize
    o_bytes = jnp.dtype(out_dtype).itemsize
    vmem_est = (
        2 * emb_dim * hidden_dim * w_bytes          # w1 + w2, one resident copy each
        + (hidden_dim + emb_dim) * 4                # biases (f32)
        + 2 * bm * emb_dim * x_bytes                # x tile, double-buffered
        + 2 * bm * emb_dim * o_bytes                # out tile, double-buffered
        + 2 * bm * max(hidden_chunk, emb_dim) * 4   # live f32 h chunk (+ headroom)
        + bm * emb_dim * 4                          # f32 accumulator
    )
    vmem_capacity = _tpu_vmem_capacity_bytes()
    vmem_budget = int(vmem_capacity * 0.85)
    if vmem_est > vmem_budget:
        # TODO(synk): add an "arbitrary" grid axis over hidden/emb with an f32
        # accumulator scratch once the whole weight pair no longer fits VMEM.
        raise ValueError(
            f"MLP tiles need ~{vmem_est // _MIB} MiB VMEM (> {vmem_budget // _MIB} "
            "MiB budget); reduce block_m / hidden_chunk or add weight tiling.")

    out2d = pl.pallas_call(
        functools.partial(_mlp_kernel, approximate_gelu=approximate_gelu,
                          hidden_chunk=hidden_chunk),
        out_shape=jax.ShapeDtypeStruct((m, emb_dim), out_dtype),
        grid_spec=pl.GridSpec(
            grid=grid,
            in_specs=[
                pl.BlockSpec((bm, emb_dim), lambda i: (i, 0)),      # x rows (pipelined)
                pl.BlockSpec(memory_space=pltpu.MemorySpace.VMEM),  # w1: resident, 1 copy
                pl.BlockSpec(memory_space=pltpu.MemorySpace.VMEM),  # b1
                pl.BlockSpec(memory_space=pltpu.MemorySpace.VMEM),  # w2: resident, 1 copy
                pl.BlockSpec(memory_space=pltpu.MemorySpace.VMEM),  # b2
            ],
            out_specs=pl.BlockSpec((bm, emb_dim), lambda i: (i, 0)),
        ),
        compiler_params=pltpu.CompilerParams(
            dimension_semantics=("parallel",),   # row tiles shard across TCs on v7x
            vmem_limit_bytes=int(min(vmem_capacity,
                                     max(32 * _MIB, int(1.35 * vmem_est)))),
        ),
    )(x2d, w1, b1_2d, w2, b2_2d)

    return out2d.reshape(*lead_shape, emb_dim)


def prepare_mlp_params(w1, b1, w2, b2, compute_dtype=jnp.bfloat16):
    """One-time conversion of the matmul weights to the MXU compute dtype
    (done OUTSIDE the per-call wrapper so the weight DMA is truly 2 B/elem).
    Biases stay f32: the bias-add happens in f32 inside the kernel."""
    return (w1.astype(compute_dtype), b1.astype(jnp.float32),
            w2.astype(compute_dtype), b2.astype(jnp.float32))


def init_mlp_params(key, emb_dim=256, hidden_dim=1024, dtype=jnp.float32):
    """Deterministic nn.Linear-style init (uniform in +/- 1/sqrt(fan_in))."""
    k1, k2, k3, k4 = jax.random.split(key, 4)
    bound1 = 1.0 / math.sqrt(emb_dim)
    bound2 = 1.0 / math.sqrt(hidden_dim)
    # stored as (in, out): transpose of PyTorch's (out, in) weight
    w1 = jax.random.uniform(k1, (emb_dim, hidden_dim), dtype, -bound1, bound1)
    b1 = jax.random.uniform(k2, (hidden_dim,), dtype, -bound1, bound1)
    w2 = jax.random.uniform(k3, (hidden_dim, emb_dim), dtype, -bound2, bound2)
    b2 = jax.random.uniform(k4, (emb_dim,), dtype, -bound2, bound2)
    return w1, b1, w2, b2


def mlp_reference(x, w1, b1, w2, b2, *, compute_dtype=jnp.float32,
                  approximate_gelu=False):
    """Plain-JAX reference; compute_dtype mirrors the kernel's matmul dtype."""
    cd = compute_dtype
    h = jnp.dot(x.astype(cd), w1.astype(cd),
                preferred_element_type=jnp.float32) + b1.astype(jnp.float32)
    h = _gelu(h, approximate_gelu)
    return jnp.dot(h.astype(cd), w2.astype(cd),
                   preferred_element_type=jnp.float32) + b2.astype(jnp.float32)


if __name__ == "__main__":
    emb_dim, hidden_dim = 256, 1024   # DetrLoc / TransformerBlock MLP defaults
    batch, num_queries = 2, 25        # 25 = DetrLoc num_queries

    key = jax.random.PRNGKey(0)
    kx, kx2, kp = jax.random.split(key, 3)
    x = jax.random.normal(kx, (batch, num_queries, emb_dim), jnp.float32)
    w1, b1, w2, b2 = init_mlp_params(kp, emb_dim, hidden_dim)
    # Convert weights to bf16 ONCE, outside the per-call wrapper.
    w1b, b1f, w2b, b2f = prepare_mlp_params(w1, b1, w2, b2)

    # Fast path: tanh GELU, bf16 MXU matmuls with f32 accumulation,
    # single ragged row tile (m = 50 in a 64-row block; tail writes masked).
    out = jax.block_until_ready(mlp_forward(x, w1b, b1f, w2b, b2f))
    assert out.shape == (batch, num_queries, emb_dim)
    assert out.dtype == x.dtype

    ref_tanh_bf16 = mlp_reference(x, w1, b1, w2, b2,
                                  compute_dtype=jnp.bfloat16, approximate_gelu=True)
    ref_exact_f32 = mlp_reference(x, w1, b1, w2, b2)
    assert jnp.allclose(out, ref_tanh_bf16, atol=2e-3, rtol=2e-3), \
        "bf16/tanh kernel vs matching reference mismatch"
    assert jnp.allclose(out, ref_exact_f32, atol=2e-2, rtol=2e-2), \
        "bf16/tanh kernel drifted from exact f32 reference"

    # Encoder-like shape: multi-step grid with a ragged tail block (m=384, bm=256).
    x_enc = jax.random.normal(kx2, (batch, 192, emb_dim), jnp.float32)
    out_enc = jax.block_until_ready(
        mlp_forward(x_enc, w1b, b1f, w2b, b2f, block_m=256))
    ref_enc = mlp_reference(x_enc, w1, b1, w2, b2,
                            compute_dtype=jnp.bfloat16, approximate_gelu=True)
    assert jnp.allclose(out_enc, ref_enc, atol=2e-3, rtol=2e-3), \
        "multi-block bf16 kernel vs reference mismatch"

    # Exact-GELU f32 validation path (weights left in f32; matches nn.GELU()).
    out_f32 = jax.block_until_ready(
        mlp_forward(x, w1, b1, w2, b2, approximate_gelu=False))
    assert jnp.allclose(out_f32, ref_exact_f32, atol=1e-3, rtol=1e-3), \
        "f32/erf kernel vs f32 reference mismatch"

    print("KERNEL_OK")
</pallas_src>

<mosaic_0001>
module attributes {stable_mosaic.version = 11 : i64} {
  func.func @_mlp_kernel(%arg0: i32, %arg1: memref<64x256xf32, #tpu.memory_space<vmem>>, %arg2: memref<256x1024xbf16, #tpu.memory_space<vmem>>, %arg3: memref<1x1024xf32, #tpu.memory_space<vmem>>, %arg4: memref<1024x256xbf16, #tpu.memory_space<vmem>>, %arg5: memref<1x256xf32, #tpu.memory_space<vmem>>, %arg6: memref<64x256xf32, #tpu.memory_space<vmem>>) attributes {dimension_semantics = [#tpu.dimension_semantics<parallel>], iteration_bounds = array<i64: 1>, scalar_prefetch = 0 : i64, scratch_operands = 0 : i64, tpu.core_type = #tpu.core_type<tc>, window_params = [{transform_indices = @transform_0, window_bounds = array<i64: 64, 256>}, {pipeline_mode = #tpu.pipeline_mode<synchronous>, transform_indices = @transform_1, window_bounds = array<i64: 256, 1024>}, {pipeline_mode = #tpu.pipeline_mode<synchronous>, transform_indices = @transform_2, window_bounds = array<i64: 1, 1024>}, {pipeline_mode = #tpu.pipeline_mode<synchronous>, transform_indices = @transform_3, window_bounds = array<i64: 1024, 256>}, {pipeline_mode = #tpu.pipeline_mode<synchronous>, transform_indices = @transform_4, window_bounds = array<i64: 1, 256>}, {transform_indices = @transform_5, window_bounds = array<i64: 64, 256>}]} {
    %c0 = arith.constant 0 : index
    %c0_0 = arith.constant 0 : index
    %0 = vector.load %arg1[%c0, %c0_0] : memref<64x256xf32, #tpu.memory_space<vmem>>, vector<64x256xf32>
    %1 = arith.truncf %0 : vector<64x256xf32> to vector<64x256xbf16>
    %cst = arith.constant 0.000000e+00 : f32
    %2 = vector.broadcast %cst : f32 to vector<64x256xf32>
    %c0_1 = arith.constant 0 : index
    %c0_2 = arith.constant 0 : index
    %3 = vector.load %arg2[%c0_1, %c0_2] : memref<256x1024xbf16, #tpu.memory_space<vmem>>, vector<256x256xbf16>
    %cst_3 = arith.constant dense<0.000000e+00> : vector<64x256xf32>
    %4 = tpu.matmul %1, %3, %cst_3 {dimension_numbers = #tpu.dot_dimension_numbers<[1], [0], [0], [1], [0, 0, 1, 1], [], []>} : vector<64x256xbf16>, vector<256x256xbf16>, vector<64x256xf32> -> vector<64x256xf32>
    %c0_4 = arith.constant 0 : index
    %c0_5 = arith.constant 0 : index
    %5 = vector.load %arg3[%c0_4, %c0_5] : memref<1x1024xf32, #tpu.memory_space<vmem>>, vector<1x256xf32>
    %6 = vector.broadcast %5 : vector<1x256xf32> to vector<64x256xf32>
    %7 = arith.addf %4, %6 : vector<64x256xf32>
    %cst_6 = arith.constant 5.000000e-01 : f32
    %8 = vector.broadcast %cst_6 : f32 to vector<64x256xf32>
    %9 = arith.mulf %8, %7 : vector<64x256xf32>
    %cst_7 = arith.constant 4.471500e-02 : f32
    %10 = vector.broadcast %cst_7 : f32 to vector<64x256xf32>
    %11 = arith.mulf %10, %7 : vector<64x256xf32>
    %12 = arith.mulf %11, %7 : vector<64x256xf32>
    %13 = arith.mulf %12, %7 : vector<64x256xf32>
    %14 = arith.addf %7, %13 : vector<64x256xf32>
    %cst_8 = arith.constant 0.797884583 : f32
    %15 = vector.broadcast %cst_8 : f32 to vector<64x256xf32>
    %16 = arith.mulf %15, %14 : vector<64x256xf32>
    %17 = math.tanh %16 : vector<64x256xf32>
    %cst_9 = arith.constant 1.000000e+00 : f32
    %18 = vector.broadcast %cst_9 : f32 to vector<64x256xf32>
    %19 = arith.addf %18, %17 : vector<64x256xf32>
    %20 = arith.mulf %9, %19 : vector<64x256xf32>
    %21 = arith.truncf %20 : vector<64x256xf32> to vector<64x256xbf16>
    %c0_10 = arith.constant 0 : index
    %c0_11 = arith.constant 0 : index
    %22 = vector.load %arg4[%c0_10, %c0_11] : memref<1024x256xbf16, #tpu.memory_space<vmem>>, vector<256x256xbf16>
    %cst_12 = arith.constant dense<0.000000e+00> : vector<64x256xf32>
    %23 = tpu.matmul %21, %22, %cst_12 {dimension_numbers = #tpu.dot_dimension_numbers<[1], [0], [0], [1], [0, 0, 1, 1], [], []>} : vector<64x256xbf16>, vector<256x256xbf16>, vector<64x256xf32> -> vector<64x256xf32>
    %24 = arith.addf %2, %23 : vector<64x256xf32>
    %c0_13 = arith.constant 0 : index
    %c256 = arith.constant 256 : index
    %25 = vector.load %arg2[%c0_13, %c256] : memref<256x1024xbf16, #tpu.memory_space<vmem>>, vector<256x256xbf16>
    %cst_14 = arith.constant dense<0.000000e+00> : vector<64x256xf32>
    %26 = tpu.matmul %1, %25, %cst_14 {dimension_numbers = #tpu.dot_dimension_numbers<[1], [0], [0], [1], [0, 0, 1, 1], [], []>} : vector<64x256xbf16>, vector<256x256xbf16>, vector<64x256xf32> -> vector<64x256xf32>
    %c0_15 = arith.constant 0 : index
    %c256_16 = arith.constant 256 : index
    %27 = vector.load %arg3[%c0_15, %c256_16] : memref<1x1024xf32, #tpu.memory_space<vmem>>, vector<1x256xf32>
    %28 = vector.broadcast %27 : vector<1x256xf32> to vector<64x256xf32>
    %29 = arith.addf %26, %28 : vector<64x256xf32>
    %cst_17 = arith.constant 5.000000e-01 : f32
    %30 = vector.broadcast %cst_17 : f32 to vector<64x256xf32>
    %31 = arith.mulf %30, %29 : vector<64x256xf32>
    %cst_18 = arith.constant 4.471500e-02 : f32
    %32 = vector.broadcast %cst_18 : f32 to vector<64x256xf32>
    %33 = arith.mulf %32, %29 : vector<64x256xf32>
    %34 = arith.mulf %33, %29 : vector<64x256xf32>
    %35 = arith.mulf %34, %29 : vector<64x256xf32>
    %36 = arith.addf %29, %35 : vector<64x256xf32>
    %cst_19 = arith.constant 0.797884583 : f32
    %37 = vector.broadcast %cst_19 : f32 to vector<64x256xf32>
    %38 = arith.mulf %37, %36 : vector<64x256xf32>
    %39 = math.tanh %38 : vector<64x256xf32>
    %cst_20 = arith.constant 1.000000e+00 : f32
    %40 = vector.broadcast %cst_20 : f32 to vector<64x256xf32>
    %41 = arith.addf %40, %39 : vector<64x256xf32>
    %42 = arith.mulf %31, %41 : vector<64x256xf32>
    %43 = arith.truncf %42 : vector<64x256xf32> to vector<64x256xbf16>
    %c256_21 = arith.constant 256 : index
    %c0_22 = arith.constant 0 : index
    %44 = vector.load %arg4[%c256_21, %c0_22] : memref<1024x256xbf16, #tpu.memory_space<vmem>>, vector<256x256xbf16>
    %cst_23 = arith.constant dense<0.000000e+00> : vector<64x256xf32>
    %45 = tpu.matmul %43, %44, %cst_23 {dimension_numbers = #tpu.dot_dimension_numbers<[1], [0], [0], [1], [0, 0, 1, 1], [], []>} : vector<64x256xbf16>, vector<256x256xbf16>, vector<64x256xf32> -> vector<64x256xf32>
    %46 = arith.addf %24, %45 : vector<64x256xf32>
    %c0_24 = arith.constant 0 : index
    %c512 = arith.constant 512 : index
    %47 = vector.load %arg2[%c0_24, %c512] : memref<256x1024xbf16, #tpu.memory_space<vmem>>, vector<256x256xbf16>
    %cst_25 = arith.constant dense<0.000000e+00> : vector<64x256xf32>
    %48 = tpu.matmul %1, %47, %cst_25 {dimension_numbers = #tpu.dot_dimension_numbers<[1], [0], [0], [1], [0, 0, 1, 1], [], []>} : vector<64x256xbf16>, vector<256x256xbf16>, vector<64x256xf32> -> vector<64x256xf32>
    %c0_26 = arith.constant 0 : index
    %c512_27 = arith.constant 512 : index
    %49 = vector.load %arg3[%c0_26, %c512_27] : memref<1x1024xf32, #tpu.memory_space<vmem>>, vector<1x256xf32>
    %50 = vector.broadcast %49 : vector<1x256xf32> to vector<64x256xf32>
    %51 = arith.addf %48, %50 : vector<64x256xf32>
    %cst_28 = arith.constant 5.000000e-01 : f32
    %52 = vector.broadcast %cst_28 : f32 to vector<64x256xf32>
    %53 = arith.mulf %52, %51 : vector<64x256xf32>
    %cst_29 = arith.constant 4.471500e-02 : f32
    %54 = vector.broadcast %cst_29 : f32 to vector<64x256xf32>
    %55 = arith.mulf %54, %51 : vector<64x256xf32>
    %56 = arith.mulf %55, %51 : vector<64x256xf32>
    %57 = arith.mulf %56, %51 : vector<64x256xf32>
    %58 = arith.addf %51, %57 : vector<64x256xf32>
    %cst_30 = arith.constant 0.797884583 : f32
    %59 = vector.broadcast %cst_30 : f32 to vector<64x256xf32>
    %60 = arith.mulf %59, %58 : vector<64x256xf32>
    %61 = math.tanh %60 : vector<64x256xf32>
    %cst_31 = arith.constant 1.000000e+00 : f32
    %62 = vector.broadcast %cst_31 : f32 to vector<64x256xf32>
    %63 = arith.addf %62, %61 : vector<64x256xf32>
    %64 = arith.mulf %53, %63 : vector<64x256xf32>
    %65 = arith.truncf %64 : vector<64x256xf32> to vector<64x256xbf16>
    %c512_32 = arith.constant 512 : index
    %c0_33 = arith.constant 0 : index
    %66 = vector.load %arg4[%c512_32, %c0_33] : memref<1024x256xbf16, #tpu.memory_space<vmem>>, vector<256x256xbf16>
    %cst_34 = arith.constant dense<0.000000e+00> : vector<64x256xf32>
    %67 = tpu.matmul %65, %66, %cst_34 {dimension_numbers = #tpu.dot_dimension_numbers<[1], [0], [0], [1], [0, 0, 1, 1], [], []>} : vector<64x256xbf16>, vector<256x256xbf16>, vector<64x256xf32> -> vector<64x256xf32>
    %68 = arith.addf %46, %67 : vector<64x256xf32>
    %c0_35 = arith.constant 0 : index
    %c768 = arith.constant 768 : index
    %69 = vector.load %arg2[%c0_35, %c768] : memref<256x1024xbf16, #tpu.memory_space<vmem>>, vector<256x256xbf16>
    %cst_36 = arith.constant dense<0.000000e+00> : vector<64x256xf32>
    %70 = tpu.matmul %1, %69, %cst_36 {dimension_numbers = #tpu.dot_dimension_numbers<[1], [0], [0], [1], [0, 0, 1, 1], [], []>} : vector<64x256xbf16>, vector<256x256xbf16>, vector<64x256xf32> -> vector<64x256xf32>
    %c0_37 = arith.constant 0 : index
    %c768_38 = arith.constant 768 : index
    %71 = vector.load %arg3[%c0_37, %c768_38] : memref<1x1024xf32, #tpu.memory_space<vmem>>, vector<1x256xf32>
    %72 = vector.broadcast %71 : vector<1x256xf32> to vector<64x256xf32>
    %73 = arith.addf %70, %72 : vector<64x256xf32>
    %cst_39 = arith.constant 5.000000e-01 : f32
    %74 = vector.broadcast %cst_39 : f32 to vector<64x256xf32>
    %75 = arith.mulf %74, %73 : vector<64x256xf32>
    %cst_40 = arith.constant 4.471500e-02 : f32
    %76 = vector.broadcast %cst_40 : f32 to vector<64x256xf32>
    %77 = arith.mulf %76, %73 : vector<64x256xf32>
    %78 = arith.mulf %77, %73 : vector<64x256xf32>
    %79 = arith.mulf %78, %73 : vector<64x256xf32>
    %80 = arith.addf %73, %79 : vector<64x256xf32>
    %cst_41 = arith.constant 0.797884583 : f32
    %81 = vector.broadcast %cst_41 : f32 to vector<64x256xf32>
    %82 = arith.mulf %81, %80 : vector<64x256xf32>
    %83 = math.tanh %82 : vector<64x256xf32>
    %cst_42 = arith.constant 1.000000e+00 : f32
    %84 = vector.broadcast %cst_42 : f32 to vector<64x256xf32>
    %85 = arith.addf %84, %83 : vector<64x256xf32>
    %86 = arith.mulf %75, %85 : vector<64x256xf32>
    %87 = arith.truncf %86 : vector<64x256xf32> to vector<64x256xbf16>
    %c768_43 = arith.constant 768 : index
    %c0_44 = arith.constant 0 : index
    %88 = vector.load %arg4[%c768_43, %c0_44] : memref<1024x256xbf16, #tpu.memory_space<vmem>>, vector<256x256xbf16>
    %cst_45 = arith.constant dense<0.000000e+00> : vector<64x256xf32>
    %89 = tpu.matmul %87, %88, %cst_45 {dimension_numbers = #tpu.dot_dimension_numbers<[1], [0], [0], [1], [0, 0, 1, 1], [], []>} : vector<64x256xbf16>, vector<256x256xbf16>, vector<64x256xf32> -> vector<64x256xf32>
    %90 = arith.addf %68, %89 : vector<64x256xf32>
    %c0_46 = arith.constant 0 : index
    %c0_47 = arith.constant 0 : index
    %91 = vector.load %arg5[%c0_46, %c0_47] : memref<1x256xf32, #tpu.memory_space<vmem>>, vector<1x256xf32>
    %92 = vector.broadcast %91 : vector<1x256xf32> to vector<64x256xf32>
    %93 = arith.addf %90, %92 : vector<64x256xf32>
    %c0_48 = arith.constant 0 : index
    %c0_49 = arith.constant 0 : index
    %94 = vector.load %arg6[%c0_48, %c0_49] : memref<64x256xf32, #tpu.memory_space<vmem>>, vector<64x256xf32>
    tpu.vector_store %arg6[%c0_48, %c0_49], %93 {strides = array<i32>} : memref<64x256xf32, #tpu.memory_space<vmem>>, vector<64x256xf32>,
    return
  }
  func.func @transform_0(%arg0: i32) -> (i32, i32) {
    %c0_i32 = arith.constant 0 : i32
    %c0_i32_0 = arith.constant 0 : i32
    return %arg0, %c0_i32 : i32, i32
  }
  func.func @transform_1(%arg0: i32) -> (i32, i32) {
    %c0_i32 = arith.constant 0 : i32
    %c0_i32_0 = arith.constant 0 : i32
    %c0_i32_1 = arith.constant 0 : i32
    return %c0_i32, %c0_i32_0 : i32, i32
  }
  func.func @transform_2(%arg0: i32) -> (i32, i32) {
    %c0_i32 = arith.constant 0 : i32
    %c0_i32_0 = arith.constant 0 : i32
    %c0_i32_1 = arith.constant 0 : i32
    return %c0_i32, %c0_i32_0 : i32, i32
  }
  func.func @transform_3(%arg0: i32) -> (i32, i32) {
    %c0_i32 = arith.constant 0 : i32
    %c0_i32_0 = arith.constant 0 : i32
    %c0_i32_1 = arith.constant 0 : i32
    return %c0_i32, %c0_i32_0 : i32, i32
  }
  func.func @transform_4(%arg0: i32) -> (i32, i32) {
    %c0_i32 = arith.constant 0 : i32
    %c0_i32_0 = arith.constant 0 : i32
    %c0_i32_1 = arith.constant 0 : i32
    return %c0_i32, %c0_i32_0 : i32, i32
  }
  func.func @transform_5(%arg0: i32) -> (i32, i32) {
    %c0_i32 = arith.constant 0 : i32
    %c0_i32_0 = arith.constant 0 : i32
    return %arg0, %c0_i32 : i32, i32
  }
}

</mosaic_0001>

<bundles_post_ra>
// kernel: mlp_forward.1
= control target key start
LH: loop header
LB: loop body
LE: loop exit
PB: predicated region body
PF: predicated region fallthrough
CT: control target
= control target key end

     0   :  { %10 = vsyncpa [#allocation3], 0  ;;  %s4539_s0 = inlined_call_operand.vmem [shape: f32[50,256], index: 0, kind: input, shape index: {}]   ;;  %s4540_s1 = inlined_call_operand.hbm [shape: bf16[256,1024], index: 1, kind: input, shape index: {}]   ;;  %s4541_s2 = inlined_call_operand.vmem [shape: f32[1,1024], index: 2, kind: input, shape index: {}]   ;;  %s4542_s3 = inlined_call_operand.hbm [shape: bf16[1024,256], index: 3, kind: input, shape index: {}]   ;;  %s4543_s4 = inlined_call_operand.vmem [shape: f32[1,256], index: 4, kind: input, shape index: {}]   ;;  %s4544_s5 = inlined_call_operand.vmem [shape: f32[50,256], index: 5, kind: output, shape index: {}]  }
   0x1   :  { %11 = vsyncpa [#allocation5], 0  ;;  %s3643_s18 = smov [#allocation2]   ;;  %s3595_s22 = scalar_lea.hbm %s4540_s1, 16384 }
   0x2   :  { %s19_s19 = sshll.u32 %s3643_s18, 4  ;;  %p3596_p0 = scmp.ne.s32.totalorder %s4540_s1, %s3595_s22  ;;  %s20_s19 = int_to_ptr.vmem [resolvable:$true] %s19_s19 }
   0x3   :  { %p3599_p1 = scmp.lt.u32.totalorder %s3595_s22, %s4540_s1 }
   0x5   :  { %p3601_p2 = pnand %p3599_p1, %p3596_p0 }
   0x7   :  { %3604 = shalt.err (!%p3601_p2)
}
   0x8   :  { %s3605_s27 = scalar_lea.vmem %s20_s19, 16384  ;;  %p3610_p4 = scmp.lt.s32.totalorder %s20_s19, %s20_s19 }
   0x9   :  { %p3606_p3 = scmp.ne.s32.totalorder %s20_s19, %s3605_s27  ;;  %p3611_p5 = scmp.lt.s32.totalorder %s3605_s27, %s3605_s27 }
   0xb   :  { %p3612_p6 = por %p3611_p5, %p3610_p4 }
   0xd   :  { %p3613_p7 = pnand %p3612_p6, %p3606_p3 }
   0xf   :  { %3616 = shalt.err (!%p3613_p7)
}
  0x10   :  { %s3644_s28 = smov 512   ;;  %s3645_s29 = smov 32  }
  0x11   :  { %25 = dma.hbm_to_vmem [thread:$0]  %s4540_s1, 16384, %s20_s19, [#allocation3], %s3644_s28, %s3644_s28, %s3645_s29  }
  0x12   :  { %s3646_s7 = smov [#allocation4]   ;;  %s3617_s11 = scalar_lea.hbm %s4542_s3, 16384 }
  0x13   :  { %s33_s8 = sshll.u32 %s3646_s7, 4  ;;  %p3618_p8 = scmp.ne.s32.totalorder %s4542_s3, %s3617_s11  ;;  %s34_s8 = int_to_ptr.vmem [resolvable:$true] %s33_s8 }
  0x14   :  { %p3621_p9 = scmp.lt.u32.totalorder %s3617_s11, %s4542_s3 }
  0x16   :  { %p3623_p10 = pnand %p3621_p9, %p3618_p8 }
  0x18   :  { %3626 = shalt.err (!%p3623_p10)
}
  0x19   :  { %s3627_s16 = scalar_lea.vmem %s34_s8, 16384  ;;  %p3632_p12 = scmp.lt.s32.totalorder %s34_s8, %s34_s8 }
  0x1a   :  { %p3628_p11 = scmp.ne.s32.totalorder %s34_s8, %s3627_s16  ;;  %p3633_p13 = scmp.lt.s32.totalorder %s3627_s16, %s3627_s16 }
  0x1c   :  { %p3634_p0 = por %p3633_p13, %p3632_p12 }
  0x1e   :  { %p3635_p1 = pnand %p3634_p0, %p3628_p11 }
  0x20   :  { %3638 = shalt.err (!%p3635_p1)
}
  0x21   :  { %s3647_s1 = smov 128   ;;  %s3648_s17 = smov 8  }
  0x22   :  { %39 = dma.hbm_to_vmem [thread:$0]  %s4542_s3, 16384, %s34_s8, [#allocation5], %s3647_s1, %s3647_s1, %s3648_s17  }
  0x23   :  { %3639 = dma.done.wait [#allocation3], 16384  }
  0x24   :  { %3640 = vsyncadd [#allocation3], 4294950912 }
  0x25   :  { %3641 = dma.done.wait [#allocation5], 16384  }
  0x26   :  { %3642 = vsyncadd [#allocation5], 4294950912  ;;  %v72_v0 = vld [vmem:[#allocation2] sm:$0xff]  ;;  %v49_v17 = vld [vmem:[%s4539_s0 + $0x8] sm:$0xff] }
  0x27   :  { %v73_v1 = vld [vmem:[#allocation2 + $0x20] sm:$0xff]  ;;  %v51_v18 = vld [vmem:[%s4539_s0 + $0x18] sm:$0xff] }
  0x28   :  { %v74_v2 = vld [vmem:[#allocation2 + $0x40] sm:$0xff]  ;;  %v2978_v3 = vcombine.high %v72_v0, %v73_v1  ;;  %v2977_v4 = vcombine.low %v72_v0, %v73_v1  ;;  %v3709_v20 = vpack.c.bf16 %v51_v18, %v49_v17  ;;  %v533_v1 = vld [vmem:[#allocation2 + $0x8] sm:$0xff] }
  0x29   :  { %v75_v5 = vld [vmem:[#allocation2 + $0x60] sm:$0xff] }
  0x2a   :  { %v2980_v6 = vcombine.high %v74_v2, %v75_v5  ;;  %v76_v7 = vld [vmem:[#allocation2 + $0x80] sm:$0xff]  ;;  %276 = vmatprep.subr.bf16.mxu1 %v2978_v3  ;;  %v2979_v9 = vcombine.low %v74_v2, %v75_v5  ;;  %308 = vmatprep.mubr.bf16.mxu1 %v3709_v20  ;;  %v534_v2 = vld [vmem:[#allocation2 + $0x28] sm:$0xff]  ;;  %v50_v5 = vld [vmem:[%s4539_s0 + $0x10] sm:$0xff] }
  0x2b   :  { %v77_v8 = vld [vmem:[#allocation2 + $0xa0] sm:$0xff]  ;;  %277 = vmatpush1.bf16.msra.mxu1 %v2977_v4 }
  0x2c   :  { %278 = vmatprep.subr.bf16.mxu1 %v2980_v6  ;;  %v2982_v10 = vcombine.high %v76_v7, %v77_v8  ;;  %v78_v11 = vld [vmem:[#allocation2 + $0xc0] sm:$0xff]  ;;  %v2981_v13 = vcombine.low %v76_v7, %v77_v8  ;;  %v535_v7 = vld [vmem:[#allocation2 + $0x48] sm:$0xff] }
  0x2d   :  { %v79_v12 = vld [vmem:[#allocation2 + $0xe0] sm:$0xff]  ;;  %v536_v8 = vld [vmem:[#allocation2 + $0x68] sm:$0xff] }
  0x2e   :  { %v2984_v14 = vcombine.high %v78_v11, %v79_v12  ;;  %v80_v15 = vld [vmem:[#allocation2 + $0x100] sm:$0xff]  ;;  %v2983_v19 = vcombine.low %v78_v11, %v79_v12  ;;  %v3010_v11 = vcombine.high %v533_v1, %v534_v2  ;;  %v3012_v17 = vcombine.high %v535_v7, %v536_v8 }
  0x2f   :  { %279 = vmatpush1.bf16.msra.mxu1 %v2979_v9  ;;  %v81_v16 = vld [vmem:[#allocation2 + $0x120] sm:$0xff]  ;;  %v53_v9 = vld [vmem:[%s4539_s0 + $0x28] sm:$0xff] }
  0x30   :  { %280 = vmatprep.subr.bf16.mxu1 %v2982_v10  ;;  %v2986_v21 = vcombine.high %v80_v15, %v81_v16  ;;  %v82_v22 = vld [vmem:[#allocation2 + $0x140] sm:$0xff]  ;;  %v2985_v24 = vcombine.low %v80_v15, %v81_v16  ;;  %v55_v10 = vld [vmem:[%s4539_s0 + $0x38] sm:$0xff]  ;;  %v538_v15 = vld [vmem:[#allocation2 + $0xa8] sm:$0xff] }
  0x31   :  { %v83_v23 = vld [vmem:[#allocation2 + $0x160] sm:$0xff]  ;;  %v3726_v16 = vpack.c.bf16 %v55_v10, %v53_v9  ;;  %v558_v9 = vld [vmem:[#allocation2 + $0x328] sm:$0xff] }
  0x32   :  { %v2988_v25 = vcombine.high %v82_v22, %v83_v23  ;;  %v84_v26 = vld [vmem:[#allocation2 + $0x180] sm:$0xff]  ;;  %v2987_v28 = vcombine.low %v82_v22, %v83_v23  ;;  %v539_v22 = vld [vmem:[#allocation2 + $0xc8] sm:$0xff] }
  0x33   :  { %281 = vmatpush1.bf16.msra.mxu1 %v2981_v13  ;;  %v85_v27 = vld [vmem:[#allocation2 + $0x1a0] sm:$0xff]  ;;  %v3009_v13 = vcombine.low %v533_v1, %v534_v2  ;;  %v540_v23 = vld [vmem:[#allocation2 + $0xe8] sm:$0xff] }
  0x34   :  { %282 = vmatprep.subr.bf16.mxu1 %v2984_v14  ;;  %v2990_v29 = vcombine.high %v84_v26, %v85_v27  ;;  %v86_v30 = vld [vmem:[#allocation2 + $0x1c0] sm:$0xff]  ;;  %v2989_v32 = vcombine.low %v84_v26, %v85_v27  ;;  %v537_v14 = vld [vmem:[#allocation2 + $0x88] sm:$0xff] }
  0x35   :  { %v87_v31 = vld [vmem:[#allocation2 + $0x1e0] sm:$0xff]  ;;  %v3014_v26 = vcombine.high %v537_v14, %v538_v15  ;;  %v554_v1 = vld [vmem:[#allocation2 + $0x2a8] sm:$0xff] }
  0x36   :  { %v2992_v33 = vcombine.high %v86_v30, %v87_v31  ;;  %v88_v34 = vld [vmem:[#allocation2 + $0x200] sm:$0xff]  ;;  %v2991_v36 = vcombine.low %v86_v30, %v87_v31  ;;  %v542_v30 = vld [vmem:[#allocation2 + $0x128] sm:$0xff] }
  0x37   :  { %283 = vmatpush1.bf16.msra.mxu1 %v2983_v19  ;;  %v89_v35 = vld [vmem:[#allocation2 + $0x220] sm:$0xff]  ;;  %v54_v19 = vld [vmem:[%s4539_s0 + $0x30] sm:$0xff] }
  0x38   :  { %284 = vmatprep.subr.bf16.mxu1 %v2986_v21  ;;  %v2994_v37 = vcombine.high %v88_v34, %v89_v35  ;;  %v90_v38 = vld [vmem:[#allocation2 + $0x240] sm:$0xff]  ;;  %v2993_v40 = vcombine.low %v88_v34, %v89_v35  ;;  %v3011_v21 = vcombine.low %v535_v7, %v536_v8  ;;  %v58_v34 = vld [vmem:[%s4539_s0 + $0x50] sm:$0xff]  ;;  %v3015_v35 = vcombine.low %v539_v22, %v540_v23  ;;  %v557_v8 = vld [vmem:[#allocation2 + $0x308] sm:$0xff] }
  0x39   :  { %v91_v39 = vld [vmem:[#allocation2 + $0x260] sm:$0xff] }
  0x3a   :  { %v92_v41 = vld [vmem:[#allocation2 + $0x280] sm:$0xff]  ;;  %v2996_v43 = vcombine.high %v90_v38, %v91_v39  ;;  %v2995_v44 = vcombine.low %v90_v38, %v91_v39  ;;  %v61_v38 = vld [vmem:[%s4539_s0 + $0x68] sm:$0xff]  ;;  %v63_v39 = vld [vmem:[%s4539_s0 + $0x78] sm:$0xff] }
  0x3b   :  { %285 = vmatpush1.bf16.msra.mxu1 %v2985_v24  ;;  %v93_v42 = vld [vmem:[#allocation2 + $0x2a0] sm:$0xff]  ;;  %v57_v24 = vld [vmem:[%s4539_s0 + $0x48] sm:$0xff] }
  0x3c   :  { %286 = vmatprep.subr.bf16.mxu1 %v2988_v25  ;;  %v94_v45 = vld [vmem:[#allocation2 + $0x2c0] sm:$0xff]  ;;  %v2998_v47 = vcombine.high %v92_v41, %v93_v42  ;;  %v2997_v48 = vcombine.low %v92_v41, %v93_v42  ;;  %v59_v25 = vld [vmem:[%s4539_s0 + $0x58] sm:$0xff] }
  0x3d   :  { %v95_v46 = vld [vmem:[#allocation2 + $0x2e0] sm:$0xff]  ;;  %v3744_v31 = vpack.c.bf16 %v59_v25, %v57_v24  ;;  %v564_v24 = vld [vmem:[#allocation2 + $0x3e8] sm:$0xff] }
  0x3e   :  { %v96_v49 = vld [vmem:[#allocation2 + $0x300] sm:$0xff]  ;;  %v3000_v51 = vcombine.high %v94_v45, %v95_v46  ;;  %v2999_v52 = vcombine.low %v94_v45, %v95_v46  ;;  %v3762_v45 = vpack.c.bf16 %v63_v39, %v61_v38  ;;  %v1465_v38 = vld [vmem:[#allocation2 + $0xb0] sm:$0xff] }
  0x3f   :  { %287 = vmatpush1.bf16.msra.mxu1 %v2987_v28  ;;  %v97_v50 = vld [vmem:[#allocation2 + $0x320] sm:$0xff]  ;;  %v3013_v28 = vcombine.low %v537_v14, %v538_v15  ;;  %v560_v14 = vld [vmem:[#allocation2 + $0x368] sm:$0xff]  ;;  %v3033_v15 = vcombine.low %v557_v8, %v558_v9 }
  0x40   :  { %288 = vmatprep.subr.bf16.mxu1 %v2990_v29  ;;  %v98_v53 = vld [vmem:[#allocation2 + $0x340] sm:$0xff]  ;;  %v3002_v55 = vcombine.high %v96_v49, %v97_v50  ;;  %v3001_v56 = vcombine.low %v96_v49, %v97_v50  ;;  %v541_v29 = vld [vmem:[#allocation2 + $0x108] sm:$0xff]  ;;  %v62_v49 = vld [vmem:[%s4539_s0 + $0x70] sm:$0xff] }
  0x41   :  { %v99_v54 = vld [vmem:[#allocation2 + $0x360] sm:$0xff]  ;;  %v3017_v42 = vcombine.low %v541_v29, %v542_v30 }
  0x42   :  { %v100_v57 = vld [vmem:[#allocation2 + $0x380] sm:$0xff]  ;;  %v3004_v59 = vcombine.high %v98_v53, %v99_v54  ;;  %v3003_v60 = vcombine.low %v98_v53, %v99_v54 }
  0x43   :  { %289 = vmatpush1.bf16.msra.mxu1 %v2989_v32  ;;  %v101_v58 = vld [vmem:[#allocation2 + $0x3a0] sm:$0xff]  ;;  %v3016_v32 = vcombine.high %v539_v22, %v540_v23  ;;  %v563_v23 = vld [vmem:[#allocation2 + $0x3c8] sm:$0xff] }
  0x44   :  { %290 = vmatprep.subr.bf16.mxu1 %v2992_v33  ;;  %v102_v61 = vld [vmem:[#allocation2 + $0x3c0] sm:$0xff]  ;;  %v3006_v63 = vcombine.high %v100_v57, %v101_v58  ;;  %v3005_v0 = vcombine.low %v100_v57, %v101_v58  ;;  %v550_v57 = vld [vmem:[#allocation2 + $0x228] sm:$0xff] }
  0x45   :  { %v103_v62 = vld [vmem:[#allocation2 + $0x3e0] sm:$0xff] }
  0x46   :  { %v3008_v3 = vcombine.high %v102_v61, %v103_v62  ;;  %v48_v4 = vld [vmem:[%s4539_s0] sm:$0xff]  ;;  %v3007_v6 = vcombine.low %v102_v61, %v103_v62  ;;  %v552_v61 = vld [vmem:[#allocation2 + $0x268] sm:$0xff] }
  0x47   :  { %291 = vmatpush1.bf16.msra.mxu1 %v2991_v36  ;;  %v3724_v12 = vpack.c.bf16 %v50_v5, %v48_v4  ;;  %v52_v18 = vld [vmem:[%s4539_s0 + $0x20] sm:$0xff]  ;;  %v543_v36 = vld [vmem:[#allocation2 + $0x148] sm:$0xff] }
  0x48   :  { %292 = vmatprep.subr.bf16.mxu1 %v2994_v37  ;;  %v3742_v27 = vpack.c.bf16 %v54_v19, %v52_v18  ;;  %v56_v33 = vld [vmem:[%s4539_s0 + $0x40] sm:$0xff]  ;;  %v544_v37 = vld [vmem:[#allocation2 + $0x168] sm:$0xff] }
  0x49   :  { %v3760_v41 = vpack.c.bf16 %v58_v34, %v56_v33  ;;  %v3020_v46 = vcombine.high %v543_v36, %v544_v37  ;;  %v555_v4 = vld [vmem:[#allocation2 + $0x2c8] sm:$0xff]  ;;  %v1462_v33 = vld [vmem:[#allocation2 + $0x50] sm:$0xff] }
  0x4a   :  { %v556_v5 = vld [vmem:[#allocation2 + $0x2e8] sm:$0xff]  ;;  %v1463_v34 = vld [vmem:[#allocation2 + $0x70] sm:$0xff] }
  0x4b   :  { %293 = vmatpush1.bf16.msra.mxu1 %v2993_v40  ;;  %v3018_v40 = vcombine.high %v541_v29, %v542_v30  ;;  %v3032_v7 = vcombine.high %v555_v4, %v556_v5  ;;  %v3031_v10 = vcombine.low %v555_v4, %v556_v5  ;;  %v561_v18 = vld [vmem:[#allocation2 + $0x388] sm:$0xff]  ;;  %v1461_v29 = vld [vmem:[#allocation2 + $0x30] sm:$0xff]  ;;  %v3039_v30 = vcombine.low %v563_v23, %v564_v24 }
  0x4c   :  { %294 = vmatprep.subr.bf16.mxu1 %v2996_v43  ;;  %v545_v43 = vld [vmem:[#allocation2 + $0x188] sm:$0xff]  ;;  %v3107_v39 = vcombine.low %v1462_v33, %v1463_v34  ;;  %v1478_v4 = vld [vmem:[#allocation2 + $0x250] sm:$0xff] }
  0x4d   :  { %v562_v19 = vld [vmem:[#allocation2 + $0x3a8] sm:$0xff]  ;;  %v1479_v5 = vld [vmem:[#allocation2 + $0x270] sm:$0xff] }
  0x4e   :  { %v3038_v22 = vcombine.high %v561_v18, %v562_v19  ;;  %v3037_v25 = vcombine.low %v561_v18, %v562_v19  ;;  %v1484_v18 = vld [vmem:[#allocation2 + $0x310] sm:$0xff] }
  0x4f   :  { %295 = vmatpush1.bf16.msra.mxu1 %v2995_v44  ;;  %v546_v44 = vld [vmem:[#allocation2 + $0x1a8] sm:$0xff]  ;;  %v1485_v19 = vld [vmem:[#allocation2 + $0x330] sm:$0xff] }
  0x50   :  { %296 = vmatprep.subr.bf16.mxu1 %v2998_v47  ;;  %v3019_v47 = vcombine.low %v543_v36, %v544_v37  ;;  %v3022_v50 = vcombine.high %v545_v43, %v546_v44  ;;  %v3021_v54 = vcombine.low %v545_v43, %v546_v44  ;;  %v3108_v36 = vcombine.high %v1462_v33, %v1463_v34  ;;  %v1464_v37 = vld [vmem:[#allocation2 + $0x90] sm:$0xff]  ;;  %v3275_v33 = vld [vmem:[#allocation4 + $0x104] ss:$8 sps:$4 sm:$0xff]  }
  0x51   :  { %v1467_v43 = vld [vmem:[#allocation2 + $0xf0] sm:$0xff]  ;;  %v3109_v44 = vcombine.low %v1464_v37, %v1465_v38  ;;  %1154 = vmatprep.subr.bf16.mxu0 %v3275_v33  ;;  %v2187_v33 = vld [vmem:[#allocation2 + $0x238] sm:$0xff] }
  0x52   :  { %v1490_v34 = vld [vmem:[#allocation2 + $0x3d0] sm:$0xff] }
  0x53   :  { %297 = vmatpush1.bf16.msra.mxu1 %v2997_v48  ;;  %v60_v48 = vld [vmem:[%s4539_s0 + $0x60] sm:$0xff] }
  0x54   :  { %298 = vmatprep.subr.bf16.mxu1 %v3000_v51  ;;  %v547_v51 = vld [vmem:[#allocation2 + $0x1c8] sm:$0xff]  ;;  %v3772_v53 = vpack.c.bf16 %v62_v49, %v60_v48  ;;  %v1469_v48 = vld [vmem:[#allocation2 + $0x130] sm:$0xff] }
  0x57   :  { %299 = vmatpush1.bf16.msra.mxu1 %v2999_v52  ;;  %v548_v52 = vld [vmem:[#allocation2 + $0x1e8] sm:$0xff] }
  0x58   :  { %300 = vmatprep.subr.bf16.mxu1 %v3002_v55  ;;  %v3024_v55 = vcombine.high %v547_v51, %v548_v52  ;;  %v3023_v58 = vcombine.low %v547_v51, %v548_v52  ;;  %v1470_v51 = vld [vmem:[#allocation2 + $0x150] sm:$0xff] }
  0x59   :  { %v1471_v52 = vld [vmem:[#allocation2 + $0x170] sm:$0xff] }
  0x5b   :  { %301 = vmatpush1.bf16.msra.mxu1 %v3001_v56  ;;  %v549_v56 = vld [vmem:[#allocation2 + $0x208] sm:$0xff] }
  0x5c   :  { %302 = vmatprep.subr.bf16.mxu1 %v3004_v59  ;;  %v3026_v59 = vcombine.high %v549_v56, %v550_v57  ;;  %v3025_v62 = vcombine.low %v549_v56, %v550_v57  ;;  %v1472_v56 = vld [vmem:[#allocation2 + $0x190] sm:$0xff] }
  0x5d   :  { %v1473_v57 = vld [vmem:[#allocation2 + $0x1b0] sm:$0xff] }
  0x5f   :  { %303 = vmatpush1.bf16.msra.mxu1 %v3003_v60  ;;  %v551_v60 = vld [vmem:[#allocation2 + $0x248] sm:$0xff] }
  0x60   :  { %304 = vmatprep.subr.bf16.mxu1 %v3006_v63  ;;  %v3028_v63 = vcombine.high %v551_v60, %v552_v61  ;;  %v3027_v2 = vcombine.low %v551_v60, %v552_v61  ;;  %v1474_v60 = vld [vmem:[#allocation2 + $0x1d0] sm:$0xff] }
  0x61   :  { %v1475_v61 = vld [vmem:[#allocation2 + $0x1f0] sm:$0xff] }
  0x63   :  { %305 = vmatpush1.bf16.msra.mxu1 %v3005_v0  ;;  %v553_v0 = vld [vmem:[#allocation2 + $0x288] sm:$0xff] }
  0x64   :  { %306 = vmatprep.subr.bf16.mxu1 %v3008_v3  ;;  %v3030_v3 = vcombine.high %v553_v0, %v554_v1 }
  0x67   :  { %307 = vmatpush1.bf16.msra.mxu1 %v3007_v6  ;;  %v3029_v6 = vcombine.low %v553_v0, %v554_v1  ;;  %v1476_v0 = vld [vmem:[#allocation2 + $0x210] sm:$0xff] }
  0x68   :  { %737 = vmatprep.subr.bf16.mxu1 %v3010_v11  ;;  %v3034_v11 = vcombine.high %v557_v8, %v558_v9  ;;  %v1477_v1 = vld [vmem:[#allocation2 + $0x230] sm:$0xff] }
  0x69   :  { %v1480_v8 = vld [vmem:[#allocation2 + $0x290] sm:$0xff] }
  0x6a   :  { %309 = vmatmul.mubr.bf16.vlgmr.msra.gmra.mrb[0].mxu1 %v3724_v12  ;;  %v1481_v9 = vld [vmem:[#allocation2 + $0x2b0] sm:$0xff] }
  0x6b   :  { %738 = vmatpush1.bf16.msra.mxu1 %v3009_v13  ;;  %318 = vmatprep.mubr.bf16.mxu1 %v3726_v16  ;;  %v559_v13 = vld [vmem:[#allocation2 + $0x348] sm:$0xff] }
  0x6c   :  { %739 = vmatprep.subr.bf16.mxu1 %v3012_v17  ;;  %v3036_v17 = vcombine.high %v559_v13, %v560_v14 }
  0x6f   :  { %740 = vmatpush1.bf16.msra.mxu1 %v3011_v21  ;;  %v3035_v21 = vcombine.low %v559_v13, %v560_v14  ;;  %v1482_v13 = vld [vmem:[#allocation2 + $0x2d0] sm:$0xff] }
  0x70   :  { %741 = vmatprep.subr.bf16.mxu1 %v3014_v26  ;;  %v3040_v26 = vcombine.high %v563_v23, %v564_v24  ;;  %v1483_v14 = vld [vmem:[#allocation2 + $0x2f0] sm:$0xff] }
  0x71   :  { %v1486_v23 = vld [vmem:[#allocation2 + $0x350] sm:$0xff] }
  0x72   :  { %319 = vmatmul.mubr.bf16.gmra.mrb[4].mxu1 %v3742_v27  ;;  %v1487_v24 = vld [vmem:[#allocation2 + $0x370] sm:$0xff] }
  0x73   :  { %742 = vmatpush1.bf16.msra.mxu1 %v3013_v28  ;;  %328 = vmatprep.mubr.bf16.mxu1 %v3744_v31  ;;  %v1460_v28 = vld [vmem:[#allocation2 + $0x10] sm:$0xff] }
  0x74   :  { %743 = vmatprep.subr.bf16.mxu1 %v3016_v32  ;;  %v3106_v32 = vcombine.high %v1460_v28, %v1461_v29 }
  0x77   :  { %744 = vmatpush1.bf16.msra.mxu1 %v3015_v35  ;;  %v3105_v35 = vcombine.low %v1460_v28, %v1461_v29  ;;  %v1488_v28 = vld [vmem:[#allocation2 + $0x390] sm:$0xff] }
  0x78   :  { %745 = vmatprep.subr.bf16.mxu1 %v3018_v40  ;;  %v3110_v40 = vcombine.high %v1464_v37, %v1465_v38  ;;  %v1489_v29 = vld [vmem:[#allocation2 + $0x3b0] sm:$0xff] }
  0x79   :  { %v3133_v37 = vcombine.low %v1488_v28, %v1489_v29  ;;  %v3278_v38 = vld [vmem:[#allocation4 + $0x114] ss:$8 sps:$4 sm:$0xff]  }
  0x7a   :  { %329 = vmatmul.mubr.bf16.gmra.mrb[8].mxu1 %v3760_v41 }
  0x7b   :  { %746 = vmatpush1.bf16.msra.mxu1 %v3017_v42  ;;  %338 = vmatprep.mubr.bf16.mxu1 %v3762_v45  ;;  %v1466_v42 = vld [vmem:[#allocation2 + $0xd0] sm:$0xff] }
  0x7c   :  { %747 = vmatprep.subr.bf16.mxu1 %v3020_v46  ;;  %v3112_v46 = vcombine.high %v1466_v42, %v1467_v43  ;;  %v3111_v49 = vcombine.low %v1466_v42, %v1467_v43  ;;  %v3281_v42 = vld [vmem:[#allocation4 + $0x124] ss:$8 sps:$4 sm:$0xff]   ;;  %v2170_v43 = vld [vmem:[#allocation2 + $0x18] sm:$0xff] }
  0x7f   :  { %748 = vmatpush1.bf16.msra.mxu1 %v3019_v47  ;;  %v1468_v47 = vld [vmem:[#allocation2 + $0x110] sm:$0xff] }
  0x80   :  { %749 = vmatprep.subr.bf16.mxu1 %v3022_v50  ;;  %v3114_v50 = vcombine.high %v1468_v47, %v1469_v48 }
  0x82   :  { %339 = vmatmul.mubr.bf16.gmra.mrb[12].mxu1 %v3772_v53 }
  0x83   :  { %750 = vmatpush1.bf16.msra.mxu1 %v3021_v54  ;;  %769 = vmatprep.mubr.bf16.mxu1 %v3709_v20  ;;  %v3113_v54 = vcombine.low %v1468_v47, %v1469_v48  ;;  %v3283_v47 = vld [vmem:[#allocation4 + $0x120] ss:$8 sps:$4 sm:$0xff]  }
  0x84   :  { %751 = vmatprep.subr.bf16.mxu1 %v3024_v55  ;;  %v3116_v55 = vcombine.high %v1470_v51, %v1471_v52 }
  0x87   :  { %752 = vmatpush1.bf16.msra.mxu1 %v3023_v58  ;;  %v3115_v58 = vcombine.low %v1470_v51, %v1471_v52  ;;  %v2173_v51 = vld [vmem:[#allocation2 + $0x78] sm:$0xff] }
  0x88   :  { %753 = vmatprep.subr.bf16.mxu1 %v3026_v59  ;;  %v3118_v59 = vcombine.high %v1472_v56, %v1473_v57 }
  0x8b   :  { %754 = vmatpush1.bf16.msra.mxu1 %v3025_v62  ;;  %v3117_v62 = vcombine.low %v1472_v56, %v1473_v57  ;;  %v2174_v56 = vld [vmem:[#allocation2 + $0x98] sm:$0xff] }
  0x8c   :  { %755 = vmatprep.subr.bf16.mxu1 %v3028_v63  ;;  %v3120_v63 = vcombine.high %v1474_v60, %v1475_v61  ;;  %v2175_v57 = vld [vmem:[#allocation2 + $0xb8] sm:$0xff] }
  0x8f   :  { %756 = vmatpush1.bf16.msra.mxu1 %v3027_v2  ;;  %v3119_v2 = vcombine.low %v1474_v60, %v1475_v61  ;;  %v3174_v60 = vcombine.high %v2174_v56, %v2175_v57  ;;  %v3289_v61 = vld [vmem:[#allocation4 + $0x140] ss:$8 sps:$4 sm:$0xff]  }
  0x90   :  { %757 = vmatprep.subr.bf16.mxu1 %v3030_v3  ;;  %v3122_v3 = vcombine.high %v1476_v0, %v1477_v1 }
  0x93   :  { %758 = vmatpush1.bf16.msra.mxu1 %v3029_v6  ;;  %v3121_v6 = vcombine.low %v1476_v0, %v1477_v1  ;;  %v3290_v0 = vld [vmem:[#allocation4 + $0x154] ss:$8 sps:$4 sm:$0xff]   ;;  %v3173_v1 = vcombine.low %v2174_v56, %v2175_v57 }
  0x94   :  { %759 = vmatprep.subr.bf16.mxu1 %v3032_v7  ;;  %v3124_v7 = vcombine.high %v1478_v4, %v1479_v5  ;;  %v3314_v57 = vld [vmem:[#allocation4 + $0x1d4] ss:$8 sps:$4 sm:$0xff]  }
  0x97   :  { %760 = vmatpush1.bf16.msra.mxu1 %v3031_v10  ;;  %v3123_v10 = vcombine.low %v1478_v4, %v1479_v5  ;;  %v2178_v4 = vld [vmem:[#allocation2 + $0x118] sm:$0xff] }
  0x98   :  { %761 = vmatprep.subr.bf16.mxu1 %v3034_v11  ;;  %v3126_v11 = vcombine.high %v1480_v8, %v1481_v9  ;;  %v2179_v5 = vld [vmem:[#allocation2 + $0x138] sm:$0xff] }
  0x9b   :  { %762 = vmatpush1.bf16.msra.mxu1 %v3033_v15  ;;  %v3125_v15 = vcombine.low %v1480_v8, %v1481_v9  ;;  %v3178_v8 = vcombine.high %v2178_v4, %v2179_v5  ;;  %v3295_v9 = vld [vmem:[#allocation4 + $0x160] ss:$8 sps:$4 sm:$0xff]  }
  0x9c   :  { %763 = vmatprep.subr.bf16.mxu1 %v3036_v17  ;;  %v3128_v17 = vcombine.high %v1482_v13, %v1483_v14 }
  0x9f   :  { %764 = vmatpush1.bf16.msra.mxu1 %v3035_v21  ;;  %v3127_v21 = vcombine.low %v1482_v13, %v1483_v14  ;;  %v3296_v13 = vld [vmem:[#allocation4 + $0x174] ss:$8 sps:$4 sm:$0xff]   ;;  %v3177_v14 = vcombine.low %v2178_v4, %v2179_v5 }
  0xa0   :  { %765 = vmatprep.subr.bf16.mxu1 %v3038_v22  ;;  %v3130_v22 = vcombine.high %v1484_v18, %v1485_v19  ;;  %v3320_v5 = vld [vmem:[#allocation4 + $0x1f4] ss:$8 sps:$4 sm:$0xff]  }
  0xa3   :  { %766 = vmatpush1.bf16.msra.mxu1 %v3037_v25  ;;  %v3129_v25 = vcombine.low %v1484_v18, %v1485_v19  ;;  %v2182_v18 = vld [vmem:[#allocation2 + $0x198] sm:$0xff] }
  0xa4   :  { %767 = vmatprep.subr.bf16.mxu1 %v3040_v26  ;;  %v3132_v26 = vcombine.high %v1486_v23, %v1487_v24  ;;  %v2183_v19 = vld [vmem:[#allocation2 + $0x1b8] sm:$0xff] }
  0xa7   :  { %768 = vmatpush1.bf16.msra.mxu1 %v3039_v30  ;;  %v3131_v30 = vcombine.low %v1486_v23, %v1487_v24  ;;  %v3299_v23 = vld [vmem:[#allocation4 + $0x184] ss:$8 sps:$4 sm:$0xff]   ;;  %v2184_v24 = vld [vmem:[#allocation2 + $0x1d8] sm:$0xff] }
  0xa8   :  { %1664 = vmatprep.subr.bf16.mxu1 %v3106_v32  ;;  %v3134_v32 = vcombine.high %v1488_v28, %v1489_v29  ;;  %v3181_v28 = vcombine.low %v2182_v18, %v2183_v19 }
  0xaa   :  { %770 = vmatmul.mubr.bf16.vlgmr.msra.gmra.mrb[16].mxu1 %v3724_v12 }
  0xab   :  { %779 = vmatprep.mubr.bf16.mxu1 %v3726_v16  ;;  %1665 = vmatpush1.bf16.msra.mxu1 %v3105_v35  ;;  %v1491_v35 = vld [vmem:[#allocation2 + $0x3f0] sm:$0xff] }
  0xac   :  { %1666 = vmatprep.subr.bf16.mxu1 %v3108_v36  ;;  %v3277_v36 = vld [vmem:[#allocation4 + $0x100] ss:$8 sps:$4 sm:$0xff]  }
  0xad   :  { %1155 = vmatpush1.bf16.msra.mxu0 %v3277_v36 }
  0xae   :  { %1156 = vmatprep.subr.bf16.mxu0 %v3278_v38  ;;  %v2188_v38 = vld [vmem:[#allocation2 + $0x258] sm:$0xff] }
  0xaf   :  { %1667 = vmatpush1.bf16.msra.mxu1 %v3107_v39  ;;  %v3280_v39 = vld [vmem:[#allocation4 + $0x110] ss:$8 sps:$4 sm:$0xff]  }
  0xb0   :  { %1668 = vmatprep.subr.bf16.mxu1 %v3110_v40  ;;  %v3136_v40 = vcombine.high %v1490_v34, %v1491_v35 }
  0xb1   :  { %1157 = vmatpush1.bf16.msra.mxu0 %v3280_v39  ;;  %v2189_v39 = vld [vmem:[#allocation2 + $0x278] sm:$0xff] }
  0xb2   :  { %780 = vmatmul.mubr.bf16.gmra.mrb[20].mxu1 %v3742_v27  ;;  %1158 = vmatprep.subr.bf16.mxu0 %v3281_v42 }
  0xb3   :  { %789 = vmatprep.mubr.bf16.mxu1 %v3744_v31  ;;  %1669 = vmatpush1.bf16.msra.mxu1 %v3109_v44  ;;  %v2171_v44 = vld [vmem:[#allocation2 + $0x38] sm:$0xff] }
  0xb4   :  { %1670 = vmatprep.subr.bf16.mxu1 %v3112_v46  ;;  %v3135_v46 = vcombine.low %v1490_v34, %v1491_v35  ;;  %v3170_v48 = vcombine.high %v2170_v43, %v2171_v44  ;;  %v3169_v52 = vcombine.low %v2170_v43, %v2171_v44  ;;  %v3304_v34 = vld [vmem:[#allocation4 + $0x190] ss:$8 sps:$4 sm:$0xff]   ;;  %v3188_v43 = vcombine.high %v2188_v38, %v2189_v39  ;;  %v3308_v44 = vld [vmem:[#allocation4 + $0x1b4] ss:$8 sps:$4 sm:$0xff]  }
  0xb5   :  { %1159 = vmatpush1.bf16.msra.mxu0 %v3283_v47  ;;  %v2191_v47 = vld [vmem:[#allocation2 + $0x2b8] sm:$0xff] }
  0xb7   :  { %1671 = vmatpush1.bf16.msra.mxu1 %v3111_v49  ;;  %v3284_v49 = vld [vmem:[#allocation4 + $0x134] ss:$8 sps:$4 sm:$0xff]  }
  0xb8   :  { %1672 = vmatprep.subr.bf16.mxu1 %v3114_v50  ;;  %v2172_v50 = vld [vmem:[#allocation2 + $0x58] sm:$0xff]  ;;  %1160 = vmatprep.subr.bf16.mxu0 %v3284_v49 }
  0xba   :  { %790 = vmatmul.mubr.bf16.gmra.mrb[24].mxu1 %v3760_v41 }
  0xbb   :  { %799 = vmatprep.mubr.bf16.mxu1 %v3762_v45  ;;  %1673 = vmatpush1.bf16.msra.mxu1 %v3113_v54  ;;  %v3172_v54 = vcombine.high %v2172_v50, %v2173_v51 }
  0xbc   :  { %1674 = vmatprep.subr.bf16.mxu1 %v3116_v55  ;;  %v3286_v55 = vld [vmem:[#allocation4 + $0x130] ss:$8 sps:$4 sm:$0xff]  }
  0xbd   :  { %1161 = vmatpush1.bf16.msra.mxu0 %v3286_v55 }
  0xbf   :  { %1675 = vmatpush1.bf16.msra.mxu1 %v3115_v58  ;;  %v3287_v58 = vld [vmem:[#allocation4 + $0x144] ss:$8 sps:$4 sm:$0xff]  }
  0xc0   :  { %1676 = vmatprep.subr.bf16.mxu1 %v3118_v59  ;;  %v3171_v59 = vcombine.low %v2172_v50, %v2173_v51  ;;  %1162 = vmatprep.subr.bf16.mxu0 %v3287_v58  ;;  %v3311_v50 = vld [vmem:[#allocation4 + $0x1c4] ss:$8 sps:$4 sm:$0xff]   ;;  %v2192_v51 = vld [vmem:[#allocation2 + $0x2d8] sm:$0xff] }
  0xc1   :  { %1163 = vmatpush1.bf16.msra.mxu0 %v3289_v61  ;;  %v2194_v58 = vld [vmem:[#allocation2 + $0x318] sm:$0xff] }
  0xc2   :  { %800 = vmatmul.mubr.bf16.gmra.mrb[28].mxu1 %v3772_v53  ;;  %1164 = vmatprep.subr.bf16.mxu0 %v3290_v0  ;;  %v2196_v0 = vld [vmem:[#allocation2 + $0x358] sm:$0xff] }
  0xc3   :  { %1677 = vmatpush1.bf16.msra.mxu1 %v3117_v62  ;;  %1696 = vmatprep.mubr.bf16.mxu1 %v3709_v20  ;;  %v2176_v62 = vld [vmem:[#allocation2 + $0xd8] sm:$0xff] }
  0xc4   :  { %1678 = vmatprep.subr.bf16.mxu1 %v3120_v63  ;;  %v2177_v63 = vld [vmem:[#allocation2 + $0xf8] sm:$0xff] }
  0xc7   :  { %1679 = vmatpush1.bf16.msra.mxu1 %v3119_v2  ;;  %v3176_v2 = vcombine.high %v2176_v62, %v2177_v63 }
  0xc8   :  { %1680 = vmatprep.subr.bf16.mxu1 %v3122_v3  ;;  %v3292_v3 = vld [vmem:[#allocation4 + $0x150] ss:$8 sps:$4 sm:$0xff]  }
  0xc9   :  { %1165 = vmatpush1.bf16.msra.mxu0 %v3292_v3 }
  0xcb   :  { %1681 = vmatpush1.bf16.msra.mxu1 %v3121_v6  ;;  %v3293_v6 = vld [vmem:[#allocation4 + $0x164] ss:$8 sps:$4 sm:$0xff]  }
  0xcc   :  { %1682 = vmatprep.subr.bf16.mxu1 %v3124_v7  ;;  %v3175_v7 = vcombine.low %v2176_v62, %v2177_v63  ;;  %1166 = vmatprep.subr.bf16.mxu0 %v3293_v6  ;;  %v3317_v63 = vld [vmem:[#allocation4 + $0x1e4] ss:$8 sps:$4 sm:$0xff]   ;;  %v2198_v6 = vld [vmem:[#allocation2 + $0x398] sm:$0xff] }
  0xcd   :  { %1167 = vmatpush1.bf16.msra.mxu0 %v3295_v9 }
  0xce   :  { %1168 = vmatprep.subr.bf16.mxu0 %v3296_v13  ;;  %v2200_v13 = vld [vmem:[#allocation2 + $0x3d8] sm:$0xff] }
  0xcf   :  { %1683 = vmatpush1.bf16.msra.mxu1 %v3123_v10  ;;  %v2180_v10 = vld [vmem:[#allocation2 + $0x158] sm:$0xff] }
  0xd0   :  { %1684 = vmatprep.subr.bf16.mxu1 %v3126_v11  ;;  %v2181_v11 = vld [vmem:[#allocation2 + $0x178] sm:$0xff] }
  0xd3   :  { %1685 = vmatpush1.bf16.msra.mxu1 %v3125_v15  ;;  %v3180_v15 = vcombine.high %v2180_v10, %v2181_v11 }
  0xd4   :  { %1686 = vmatprep.subr.bf16.mxu1 %v3128_v17  ;;  %v3298_v17 = vld [vmem:[#allocation4 + $0x170] ss:$8 sps:$4 sm:$0xff]  }
  0xd5   :  { %1169 = vmatpush1.bf16.msra.mxu0 %v3298_v17 }
  0xd6   :  { %1170 = vmatprep.subr.bf16.mxu0 %v3299_v23  ;;  %v104_v23 = vld [vmem:[%s4541_s2] sm:$0x3] }
  0xd7   :  { %1687 = vmatpush1.bf16.msra.mxu1 %v3127_v21  ;;  %v3179_v21 = vcombine.low %v2180_v10, %v2181_v11  ;;  %v3325_v11 = vld [vmem:[#allocation4 + $0x4] ss:$8 sps:$4 sm:$0xff]  }
  0xd8   :  { %1688 = vmatprep.subr.bf16.mxu1 %v3130_v22  ;;  %v3182_v22 = vcombine.high %v2182_v18, %v2183_v19  ;;  %v106_v19 = vlaneseq }
  0xdb   :  { %1689 = vmatpush1.bf16.msra.mxu1 %v3129_v25  ;;  %v2185_v25 = vld [vmem:[#allocation2 + $0x1f8] sm:$0xff] }
  0xdc   :  { %1690 = vmatprep.subr.bf16.mxu1 %v3132_v26  ;;  %v3301_v26 = vld [vmem:[#allocation4 + $0x180] ss:$8 sps:$4 sm:$0xff]   ;;  %v3184_v29 = vcombine.high %v2184_v24, %v2185_v25  ;;  %v3183_v35 = vcombine.low %v2184_v24, %v2185_v25 }
  0xdd   :  { %1171 = vmatpush1.bf16.msra.mxu0 %v3301_v26 }
  0xdf   :  { %1691 = vmatpush1.bf16.msra.mxu1 %v3131_v30  ;;  %v3302_v30 = vld [vmem:[#allocation4 + $0x194] ss:$8 sps:$4 sm:$0xff]  }
  0xe0   :  { %1692 = vmatprep.subr.bf16.mxu1 %v3134_v32  ;;  %v2186_v32 = vld [vmem:[#allocation2 + $0x218] sm:$0xff]  ;;  %1172 = vmatprep.subr.bf16.mxu0 %v3302_v30 }
  0xe1   :  { %v3186_v36 = vcombine.high %v2186_v32, %v2187_v33  ;;  %1173 = vmatpush1.bf16.msra.mxu0 %v3304_v34  ;;  %v3185_v42 = vcombine.low %v2186_v32, %v2187_v33 }
  0xe3   :  { %1693 = vmatpush1.bf16.msra.mxu1 %v3133_v37  ;;  %v3305_v37 = vld [vmem:[#allocation4 + $0x1a4] ss:$8 sps:$4 sm:$0xff]  }
  0xe4   :  { %1694 = vmatprep.subr.bf16.mxu1 %v3136_v40  ;;  %v3307_v40 = vld [vmem:[#allocation4 + $0x1a0] ss:$8 sps:$4 sm:$0xff]   ;;  %1174 = vmatprep.subr.bf16.mxu0 %v3305_v37 }
  0xe5   :  { %1175 = vmatpush1.bf16.msra.mxu0 %v3307_v40 }
  0xe6   :  { %1176 = vmatprep.subr.bf16.mxu0 %v3308_v44 }
  0xe7   :  { %1695 = vmatpush1.bf16.msra.mxu1 %v3135_v46  ;;  %v2190_v46 = vld [vmem:[#allocation2 + $0x298] sm:$0xff] }
  0xe8   :  { %2374 = vmatprep.subr.bf16.mxu1 %v3170_v48  ;;  %v3310_v48 = vld [vmem:[#allocation4 + $0x1b0] ss:$8 sps:$4 sm:$0xff]   ;;  %v3190_v49 = vcombine.high %v2190_v46, %v2191_v47  ;;  %v3189_v55 = vcombine.low %v2190_v46, %v2191_v47 }
  0xe9   :  { %1177 = vmatpush1.bf16.msra.mxu0 %v3310_v48 }
  0xea   :  { %1697 = vmatmul.mubr.bf16.vlgmr.msra.gmra.mrb[32].mxu1 %v3724_v12  ;;  %1178 = vmatprep.subr.bf16.mxu0 %v3311_v50 }
  0xeb   :  { %2375 = vmatpush1.bf16.msra.mxu1 %v3169_v52  ;;  %1706 = vmatprep.mubr.bf16.mxu1 %v3726_v16  ;;  %v2193_v52 = vld [vmem:[#allocation2 + $0x2f8] sm:$0xff] }
  0xec   :  { %2376 = vmatprep.subr.bf16.mxu1 %v3172_v54  ;;  %v3313_v54 = vld [vmem:[#allocation4 + $0x1c0] ss:$8 sps:$4 sm:$0xff]   ;;  %v3192_v56 = vcombine.high %v2192_v51, %v2193_v52  ;;  %v3191_v61 = vcombine.low %v2192_v51, %v2193_v52 }
  0xed   :  { %1179 = vmatpush1.bf16.msra.mxu0 %v3313_v54 }
  0xee   :  { %1180 = vmatprep.subr.bf16.mxu0 %v3314_v57 }
  0xef   :  { %2377 = vmatpush1.bf16.msra.mxu1 %v3171_v59  ;;  %v2195_v59 = vld [vmem:[#allocation2 + $0x338] sm:$0xff] }
  0xf0   :  { %2378 = vmatprep.subr.bf16.mxu1 %v3174_v60  ;;  %v3316_v60 = vld [vmem:[#allocation4 + $0x1d0] ss:$8 sps:$4 sm:$0xff]   ;;  %v3194_v62 = vcombine.high %v2194_v58, %v2195_v59  ;;  %v3193_v3 = vcombine.low %v2194_v58, %v2195_v59 }
  0xf1   :  { %1181 = vmatpush1.bf16.msra.mxu0 %v3316_v60 }
  0xf2   :  { %1707 = vmatmul.mubr.bf16.gmra.mrb[36].mxu1 %v3742_v27  ;;  %1182 = vmatprep.subr.bf16.mxu0 %v3317_v63 }
  0xf3   :  { %2379 = vmatpush1.bf16.msra.mxu1 %v3173_v1  ;;  %1716 = vmatprep.mubr.bf16.mxu1 %v3744_v31  ;;  %v2197_v1 = vld [vmem:[#allocation2 + $0x378] sm:$0xff] }
  0xf4   :  { %2380 = vmatprep.subr.bf16.mxu1 %v3176_v2  ;;  %v3319_v2 = vld [vmem:[#allocation4 + $0x1e0] ss:$8 sps:$4 sm:$0xff]   ;;  %v3196_v4 = vcombine.high %v2196_v0, %v2197_v1  ;;  %v3195_v9 = vcombine.low %v2196_v0, %v2197_v1 }
  0xf5   :  { %1183 = vmatpush1.bf16.msra.mxu0 %v3319_v2 }
  0xf6   :  { %1184 = vmatprep.subr.bf16.mxu0 %v3320_v5 }
  0xf7   :  { %2381 = vmatpush1.bf16.msra.mxu1 %v3175_v7  ;;  %v2199_v7 = vld [vmem:[#allocation2 + $0x3b8] sm:$0xff] }
  0xf8   :  { %2382 = vmatprep.subr.bf16.mxu1 %v3178_v8  ;;  %v3322_v8 = vld [vmem:[#allocation4 + $0x1f0] ss:$8 sps:$4 sm:$0xff]   ;;  %v3198_v10 = vcombine.high %v2198_v6, %v2199_v7 }
  0xf9   :  { %1185 = vmatpush1.bf16.msra.mxu0 %v3322_v8 }
  0xfa   :  { %1717 = vmatmul.mubr.bf16.gmra.mrb[40].mxu1 %v3760_v41  ;;  %1387 = vmatprep.subr.bf16.mxu0 %v3325_v11 }
  0xfb   :  { %2383 = vmatpush1.bf16.msra.mxu1 %v3177_v14  ;;  %1726 = vmatprep.mubr.bf16.mxu1 %v3762_v45  ;;  %v2201_v14 = vld [vmem:[#allocation2 + $0x3f8] sm:$0xff] }
  0xfc   :  { %2384 = vmatprep.subr.bf16.mxu1 %v3180_v15  ;;  %v3197_v15 = vcombine.low %v2198_v6, %v2199_v7  ;;  %v3200_v17 = vcombine.high %v2200_v13, %v2201_v14  ;;  %v3199_v18 = vcombine.low %v2200_v13, %v2201_v14 }
  0xff   :  { %2385 = vmatpush1.bf16.msra.mxu1 %v3179_v21  ;;  %v107_v21 = vshrl.u32 %v106_v19, 7 }
 0x100   :  { %2386 = vmatprep.subr.bf16.mxu1 %v3182_v22 }
 0x101   :  { %v3796_v22 = vsub.s32 0, %v107_v21  ;;  %v3801_v24 = vsub.s32 1, %v107_v21 }
 0x102   :  { %1727 = vmatmul.mubr.bf16.gmra.mrb[44].mxu1 %v3772_v53 }
 0x103   :  { %2387 = vmatpush1.bf16.msra.mxu1 %v3181_v28  ;;  %2406 = vmatprep.mubr.bf16.mxu1 %v3709_v20  ;;  %v3187_v20 = vcombine.low %v2188_v38, %v2189_v39  ;;  %v3804_v25 = vrot.slane %v104_v23, %v3796_v22 }
 0x104   :  { %2388 = vmatprep.subr.bf16.mxu1 %v3184_v29 }
 0x107   :  { %2389 = vmatpush1.bf16.msra.mxu1 %v3183_v35 }
 0x108   :  { %2390 = vmatprep.subr.bf16.mxu1 %v3186_v36 }
 0x10b   :  { %2391 = vmatpush1.bf16.msra.mxu1 %v3185_v42 }
 0x10c   :  { %2392 = vmatprep.subr.bf16.mxu1 %v3188_v43 }
 0x10f   :  { %2393 = vmatpush1.bf16.msra.mxu1 %v3187_v20 }
 0x110   :  { %2394 = vmatprep.subr.bf16.mxu1 %v3190_v49 }
 0x113   :  { %2395 = vmatpush1.bf16.msra.mxu1 %v3189_v55 }
 0x114   :  { %2396 = vmatprep.subr.bf16.mxu1 %v3192_v56 }
 0x117   :  { %2397 = vmatpush1.bf16.msra.mxu1 %v3191_v61 }
 0x118   :  { %2398 = vmatprep.subr.bf16.mxu1 %v3194_v62 }
 0x11b   :  { %2399 = vmatpush1.bf16.msra.mxu1 %v3193_v3 }
 0x11c   :  { %2400 = vmatprep.subr.bf16.mxu1 %v3196_v4 }
 0x11f   :  { %2401 = vmatpush1.bf16.msra.mxu1 %v3195_v9 }
 0x120   :  { %2402 = vmatprep.subr.bf16.mxu1 %v3198_v10 }
 0x123   :  { %2403 = vmatpush1.bf16.msra.mxu1 %v3197_v15 }
 0x124   :  { %2404 = vmatprep.subr.bf16.mxu1 %v3200_v17 }
 0x127   :  { %2405 = vmatpush1.bf16.msra.mxu1 %v3199_v18 }
 0x12a   :  { %2407 = vmatmul.mubr.bf16.vlgmr.msra.gmra.mrb[48].mxu1 %v3724_v12  ;;  %v3808_v12 = vrot.slane %v104_v23, %v3801_v24 }
 0x12b   :  { %2416 = vmatprep.mubr.bf16.mxu1 %v3726_v16 }
 0x132   :  { %2417 = vmatmul.mubr.bf16.gmra.mrb[52].mxu1 %v3742_v27 }
 0x133   :  { %2426 = vmatprep.mubr.bf16.mxu1 %v3744_v31 }
 0x13a   :  { %2427 = vmatmul.mubr.bf16.gmra.mrb[56].mxu1 %v3760_v41 }
 0x13b   :  { %2436 = vmatprep.mubr.bf16.mxu1 %v3762_v45 }
 0x13d   :  { %v310_v16 = vpop.f32.mrb[0].mxu1 }
 0x13e   :  { %v311_v27 = vadd.f32 %v310_v16, %v3804_v25  ;;  %v312_v31 = vpop.f32.mrb[1].mxu1 }
 0x13f   :  { %v3813_v26 = vadd.f32 %v312_v31, %v3808_v12  ;;  %v314_v28 = vpop.f32.mrb[2].mxu1 }
 0x140   :  { %v365_v29 = vmul.f32 0.044715, %v311_v27  ;;  %v3816_v30 = vadd.f32 %v314_v28, %v3804_v25  ;;  %v316_v32 = vpop.f32.mrb[3].mxu1  ;;  %v349_v17 = vmul.f32 0.5, %v311_v27 }
 0x141   :  { %v366_v41 = vmul.f32 0.044715, %v3813_v26  ;;  %v3820_v33 = vadd.f32 %v316_v32, %v3808_v12  ;;  %v350_v28 = vmul.f32 0.5, %v3813_v26 }
 0x142   :  { %v381_v34 = vmul.f32 %v365_v29, %v311_v27  ;;  %v367_v45 = vmul.f32 0.044715, %v3816_v30  ;;  %2437 = vmatmul.mubr.bf16.gmra.mrb[60].mxu1 %v3772_v53 }
 0x143   :  { %v382_v35 = vmul.f32 %v366_v41, %v3813_v26  ;;  %v368_v36 = vmul.f32 0.044715, %v3820_v33 }
 0x144   :  { %v397_v37 = vmul.f32 %v381_v34, %v311_v27  ;;  %v383_v38 = vmul.f32 %v367_v45, %v3816_v30  ;;  %v351_v45 = vmul.f32 0.5, %v3816_v30 }
 0x145   :  { %v398_v39 = vmul.f32 %v382_v35, %v3813_v26  ;;  %v384_v40 = vmul.f32 %v368_v36, %v3820_v33  ;;  %v320_v42 = vpop.f32.mrb[4].mxu1 }
 0x146   :  { %v413_v43 = vadd.f32 %v397_v37, %v311_v27  ;;  %v399_v44 = vmul.f32 %v383_v38, %v3816_v30  ;;  %v3831_v46 = vadd.f32 %v320_v42, %v3804_v25  ;;  %v322_v47 = vpop.f32.mrb[5].mxu1 }
 0x147   :  { %v400_v53 = vmul.f32 %v384_v40, %v3820_v33  ;;  %v3835_v48 = vadd.f32 %v322_v47, %v3808_v12  ;;  %v324_v20 = vpop.f32.mrb[6].mxu1  ;;  %v414_v49 = vadd.f32 %v398_v39, %v3813_v26  ;;  %v352_v26 = vmul.f32 0.5, %v3820_v33 }
 0x148   :  { %v429_v50 = vmul.f32 0.7978846, %v413_v43  ;;  %v415_v51 = vadd.f32 %v399_v44, %v3816_v30  ;;  %v369_v52 = vmul.f32 0.044715, %v3831_v46  ;;  %v3841_v54 = vadd.f32 %v324_v20, %v3804_v25  ;;  %v326_v55 = vpop.f32.mrb[7].mxu1 }
 0x149   :  { %v370_v56 = vmul.f32 0.044715, %v3835_v48  ;;  %v3845_v57 = vadd.f32 %v326_v55, %v3808_v12  ;;  %v416_v58 = vadd.f32 %v400_v53, %v3820_v33  ;;  %v430_v59 = vmul.f32 0.7978846, %v414_v49 }
 0x14a   :  { %3467 = vtanh.f32 %v429_v50  ;;  %v431_v60 = vmul.f32 0.7978846, %v415_v51  ;;  %v385_v61 = vmul.f32 %v369_v52, %v3831_v46  ;;  %v371_v62 = vmul.f32 0.044715, %v3841_v54 }
 0x14b   :  { %v386_v63 = vmul.f32 %v370_v56, %v3835_v48  ;;  %v372_v0 = vmul.f32 0.044715, %v3845_v57  ;;  %v432_v1 = vmul.f32 0.7978846, %v416_v58  ;;  %3469 = vtanh.f32 %v430_v59 }
 0x14c   :  { %3471 = vtanh.f32 %v431_v60  ;;  %v401_v2 = vmul.f32 %v385_v61, %v3831_v46  ;;  %v387_v3 = vmul.f32 %v371_v62, %v3841_v54 }
 0x14d   :  { %v402_v4 = vmul.f32 %v386_v63, %v3835_v48  ;;  %v388_v5 = vmul.f32 %v372_v0, %v3845_v57  ;;  %v330_v6 = vpop.f32.mrb[8].mxu1  ;;  %3473 = vtanh.f32 %v432_v1 }
 0x14e   :  { %v403_v7 = vmul.f32 %v387_v3, %v3841_v54  ;;  %v3858_v8 = vadd.f32 %v330_v6, %v3804_v25  ;;  %v332_v9 = vpop.f32.mrb[9].mxu1  ;;  %v417_v15 = vadd.f32 %v401_v2, %v3831_v46 }
 0x14f   :  { %v404_v10 = vmul.f32 %v388_v5, %v3845_v57  ;;  %v3862_v11 = vadd.f32 %v332_v9, %v3808_v12  ;;  %v334_v13 = vpop.f32.mrb[10].mxu1  ;;  %v418_v14 = vadd.f32 %v402_v4, %v3835_v48 }
 0x150   :  { %v373_v18 = vmul.f32 0.044715, %v3858_v8  ;;  %v3868_v19 = vadd.f32 %v334_v13, %v3804_v25  ;;  %v336_v21 = vpop.f32.mrb[11].mxu1  ;;  %v419_v23 = vadd.f32 %v403_v7, %v3841_v54  ;;  %v433_v34 = vmul.f32 0.7978846, %v417_v15 }
 0x151   :  { %v374_v16 = vmul.f32 0.044715, %v3862_v11  ;;  %v3873_v31 = vadd.f32 %v336_v21, %v3808_v12  ;;  %v420_v29 = vadd.f32 %v404_v10, %v3845_v57  ;;  %v434_v41 = vmul.f32 0.7978846, %v418_v14 }
 0x152   :  { %v389_v32 = vmul.f32 %v373_v18, %v3858_v8  ;;  %v375_v27 = vmul.f32 0.044715, %v3868_v19  ;;  %v435_v40 = vmul.f32 0.7978846, %v419_v23  ;;  %v354_v15 = vmul.f32 0.5, %v3835_v48 }
 0x153   :  { %v390_v35 = vmul.f32 %v374_v16, %v3862_v11  ;;  %v376_v36 = vmul.f32 0.044715, %v3873_v31  ;;  %v436_v37 = vmul.f32 0.7978846, %v420_v29  ;;  %3475 = vtanh.f32 %v434_v41 }
 0x154   :  { %v3468_v38 = vpop.eup %3467  ;;  %v391_v39 = vmul.f32 %v375_v27, %v3868_v19  ;;  %v405_v43 = vmul.f32 %v389_v32, %v3858_v8  ;;  %v356_v23 = vmul.f32 0.5, %v3845_v57  ;;  %v353_v29 = vmul.f32 0.5, %v3831_v46 }
 0x155   :  { %v3470_v42 = vpop.eup %3469  ;;  %v392_v44 = vmul.f32 %v376_v36, %v3873_v31  ;;  %v340_v47 = vpop.f32.mrb[12].mxu1  ;;  %v461_v53 = vadd.f32 1.0, %v3468_v38  ;;  %3477 = vtanh.f32 %v436_v37  ;;  %v406_v20 = vmul.f32 %v390_v35, %v3862_v11 }
 0x156   :  { %v3472_v30 = vpop.eup %3471  ;;  %v3888_v49 = vadd.f32 %v340_v47, %v3804_v25  ;;  %v342_v50 = vpop.f32.mrb[13].mxu1  ;;  %v462_v51 = vadd.f32 1.0, %v3470_v42  ;;  %3479 = vtanh.f32 %v433_v34  ;;  %v407_v52 = vmul.f32 %v391_v39, %v3868_v19 }
 0x157   :  { %v3474_v33 = vpop.eup %3473  ;;  %v408_v55 = vmul.f32 %v392_v44, %v3873_v31  ;;  %v3893_v56 = vadd.f32 %v342_v50, %v3808_v12  ;;  %v344_v58 = vpop.f32.mrb[14].mxu1  ;;  %v463_v59 = vadd.f32 1.0, %v3472_v30  ;;  %v3899_v0 = vmul.f32 %v461_v53, %v349_v17 }
 0x158   :  { %v377_v60 = vmul.f32 0.044715, %v3888_v49  ;;  %v3897_v61 = vadd.f32 %v344_v58, %v3804_v25  ;;  %v346_v62 = vpop.f32.mrb[15].mxu1  ;;  %v464_v63 = vadd.f32 1.0, %v3474_v33  ;;  %3481 = vtanh.f32 %v435_v40 }
 0x159   :  { %v378_v1 = vmul.f32 0.044715, %v3893_v56  ;;  %v3903_v2 = vadd.f32 %v346_v62, %v3808_v12  ;;  %v3905_v3 = vmul.f32 %v463_v59, %v351_v45  ;;  %v3909_v6 = vmul.f32 %v462_v51, %v350_v28 }
 0x15a   :  { %v393_v4 = vmul.f32 %v377_v60, %v3888_v49  ;;  %v379_v5 = vmul.f32 0.044715, %v3897_v61  ;;  %v3911_v25 = vmul.f32 %v464_v63, %v352_v26  ;;  %v422_v12 = vadd.f32 %v406_v20, %v3862_v11 }
 0x15b   :  { %v394_v7 = vmul.f32 %v378_v1, %v3893_v56  ;;  %v380_v9 = vmul.f32 0.044715, %v3903_v2  ;;  %v493_v10 = vpack.c.bf16 %v3905_v3, %v3899_v0  ;;  %v424_v17 = vadd.f32 %v408_v55, %v3873_v31  ;;  %v3379_v3 = vld [vmem:[#allocation4 + $0x224] ss:$8 sps:$4 sm:$0xff]  }
 0x15c   :  { %v395_v13 = vmul.f32 %v379_v5, %v3897_v61  ;;  %v494_v14 = vpack.c.bf16 %v3911_v25, %v3909_v6  ;;  %v438_v16 = vmul.f32 0.7978846, %v422_v12  ;;  %v421_v27 = vadd.f32 %v405_v43, %v3858_v8 }
 0x15d   :  { %v410_v18 = vmul.f32 %v394_v7, %v3893_v56  ;;  %v396_v21 = vmul.f32 %v380_v9, %v3903_v2  ;;  %v3476_v28 = vpop.eup %3475  ;;  %v440_v32 = vmul.f32 0.7978846, %v424_v17  ;;  %v423_v41 = vadd.f32 %v407_v52, %v3868_v19 }
 0x15e   :  { %v409_v48 = vmul.f32 %v393_v4, %v3888_v49  ;;  %v466_v35 = vadd.f32 1.0, %v3476_v28  ;;  %3483 = vtanh.f32 %v438_v16  ;;  %v411_v37 = vmul.f32 %v395_v13, %v3897_v61 }
 0x15f   :  { %v3478_v34 = vpop.eup %3477  ;;  %v412_v45 = vmul.f32 %v396_v21, %v3903_v2  ;;  %3485 = vtanh.f32 %v440_v32  ;;  %v426_v38 = vadd.f32 %v410_v18, %v3893_v56  ;;  %v355_v39 = vmul.f32 0.5, %v3841_v54 }
 0x160   :  { %v3480_v36 = vpop.eup %3479  ;;  %v468_v57 = vadd.f32 1.0, %v3478_v34  ;;  %v3933_v46 = vmul.f32 %v466_v35, %v354_v15  ;;  %v437_v43 = vmul.f32 0.7978846, %v421_v27  ;;  %v439_v44 = vmul.f32 0.7978846, %v423_v41 }
 0x161   :  { %v465_v26 = vadd.f32 1.0, %v3480_v36  ;;  %v428_v40 = vadd.f32 %v412_v45, %v3903_v2  ;;  %v442_v47 = vmul.f32 0.7978846, %v426_v38  ;;  %v425_v50 = vadd.f32 %v409_v48, %v3888_v49 }
 0x162   :  { %v3937_v42 = vmul.f32 %v468_v57, %v356_v23  ;;  %v3482_v53 = vpop.eup %3481  ;;  %3487 = vtanh.f32 %v437_v43  ;;  %v427_v54 = vadd.f32 %v411_v37, %v3897_v61  ;;  %v358_v60 = vmul.f32 0.5, %v3862_v11 }
 0x163   :  { %v3939_v30 = vmul.f32 %v465_v26, %v353_v29  ;;  %v444_v20 = vmul.f32 0.7978846, %v428_v40  ;;  %v467_v33 = vadd.f32 1.0, %v3482_v53  ;;  %3489 = vtanh.f32 %v439_v44 }
 0x164   :  { %v496_v51 = vpack.c.bf16 %v3937_v42, %v3933_v46  ;;  %v441_v52 = vmul.f32 0.7978846, %v425_v50  ;;  %3491 = vtanh.f32 %v442_v47  ;;  %v443_v58 = vmul.f32 0.7978846, %v427_v54 }
 0x165   :  { %v3945_v55 = vmul.f32 %v467_v33, %v355_v39  ;;  %3493 = vtanh.f32 %v444_v20  ;;  %v360_v63 = vmul.f32 0.5, %v3873_v31  ;;  %v357_v12 = vmul.f32 0.5, %v3858_v8 }
 0x166   :  { %3495 = vtanh.f32 %v441_v52  ;;  %v359_v15 = vmul.f32 0.5, %v3868_v19  ;;  %v362_v31 = vmul.f32 0.5, %v3893_v56  ;;  %v364_v16 = vmul.f32 0.5, %v3903_v2 }
 0x167   :  { %v495_v59 = vpack.c.bf16 %v3945_v55, %v3939_v30  ;;  %3497 = vtanh.f32 %v443_v58  ;;  %v361_v8 = vmul.f32 0.5, %v3888_v49  ;;  %v363_v34 = vmul.f32 0.5, %v3897_v61  ;;  %v565_v61 = vld [vmem:[%s4541_s2 + $0x2] sm:$0x3] }
 0x168   :  { %v3484_v62 = vpop.eup %3483  ;;  %v3985_v39 = vrot.slane %v565_v61, %v3796_v22  ;;  %v3988_v26 = vrot.slane %v565_v61, %v3801_v24 }
 0x169   :  { %v3486_v1 = vpop.eup %3485  ;;  %v470_v4 = vadd.f32 1.0, %v3484_v62 }
 0x16a   :  { %v472_v5 = vadd.f32 1.0, %v3486_v1 }
 0x16b   :  { %v3951_v7 = vmul.f32 %v470_v4, %v358_v60 }
 0x16c   :  { %v3953_v9 = vmul.f32 %v472_v5, %v360_v63  ;;  %v3488_v13 = vpop.eup %3487 }
 0x16d   :  { %v3490_v17 = vpop.eup %3489  ;;  %v469_v18 = vadd.f32 1.0, %v3488_v13 }
 0x16e   :  { %v498_v11 = vpack.c.bf16 %v3953_v9, %v3951_v7  ;;  %v3492_v21 = vpop.eup %3491  ;;  %v471_v23 = vadd.f32 1.0, %v3490_v17  ;;  %v3383_v7 = vld [vmem:[#allocation4 + $0x240] ss:$8 sps:$4 sm:$0xff]  }
 0x16f   :  { %v3494_v28 = vpop.eup %3493  ;;  %v3961_v29 = vmul.f32 %v469_v18, %v357_v12  ;;  %v474_v32 = vadd.f32 1.0, %v3492_v21 }
 0x170   :  { %v3496_v27 = vpop.eup %3495  ;;  %v3964_v41 = vmul.f32 %v471_v23, %v359_v15  ;;  %v476_v19 = vadd.f32 1.0, %v3494_v28 }
 0x171   :  { %v3498_v48 = vpop.eup %3497  ;;  %v3967_v45 = vmul.f32 %v474_v32, %v362_v31  ;;  %v473_v56 = vadd.f32 1.0, %v3496_v27 }
 0x172   :  { %v497_v35 = vpack.c.bf16 %v3964_v41, %v3961_v29  ;;  %v3971_v2 = vmul.f32 %v476_v19, %v364_v16  ;;  %v475_v36 = vadd.f32 1.0, %v3498_v48 }
 0x173   :  { %v3973_v37 = vmul.f32 %v473_v56, %v361_v8 }
 0x174   :  { %v3977_v57 = vmul.f32 %v475_v36, %v363_v34 }
 0x17d   :  { %v771_v40 = vpop.f32.mrb[16].mxu1 }
 0x17e   :  { %v772_v43 = vadd.f32 %v771_v40, %v3985_v39  ;;  %v773_v44 = vpop.f32.mrb[17].mxu1 }
 0x17f   :  { %v774_v47 = vadd.f32 %v773_v44, %v3988_v26  ;;  %v775_v53 = vpop.f32.mrb[18].mxu1 }
 0x180   :  { %v826_v20 = vmul.f32 0.044715, %v772_v43  ;;  %v776_v50 = vadd.f32 %v775_v53, %v3985_v39  ;;  %v777_v33 = vpop.f32.mrb[19].mxu1 }
 0x181   :  { %v827_v54 = vmul.f32 0.044715, %v774_v47  ;;  %v3994_v52 = vadd.f32 %v777_v33, %v3988_v26 }
 0x182   :  { %v842_v58 = vmul.f32 %v826_v20, %v772_v43  ;;  %v828_v60 = vmul.f32 0.044715, %v776_v50 }
 0x183   :  { %v829_v62 = vmul.f32 0.044715, %v3994_v52  ;;  %v843_v63 = vmul.f32 %v827_v54, %v774_v47 }
 0x184   :  { %v858_v1 = vmul.f32 %v842_v58, %v772_v43  ;;  %v844_v4 = vmul.f32 %v828_v60, %v776_v50 }
 0x185   :  { %v781_v5 = vpop.f32.mrb[20].mxu1  ;;  %v845_v12 = vmul.f32 %v829_v62, %v3994_v52  ;;  %v859_v13 = vmul.f32 %v843_v63, %v774_v47 }
 0x186   :  { %v860_v15 = vmul.f32 %v844_v4, %v776_v50  ;;  %v3999_v17 = vadd.f32 %v781_v5, %v3985_v39  ;;  %v783_v18 = vpop.f32.mrb[21].mxu1  ;;  %v874_v31 = vadd.f32 %v858_v1, %v772_v43 }
 0x187   :  { %v784_v21 = vadd.f32 %v783_v18, %v3988_v26  ;;  %v785_v23 = vpop.f32.mrb[22].mxu1  ;;  %v861_v16 = vmul.f32 %v845_v12, %v3994_v52  ;;  %v875_v28 = vadd.f32 %v859_v13, %v774_v47  ;;  %v811_v13 = vmul.f32 0.5, %v774_v47 }
 0x188   :  { %v830_v32 = vmul.f32 0.044715, %v3999_v17  ;;  %v4005_v8 = vadd.f32 %v785_v23, %v3985_v39  ;;  %v787_v27 = vpop.f32.mrb[23].mxu1  ;;  %v876_v19 = vadd.f32 %v860_v15, %v776_v50  ;;  %v890_v34 = vmul.f32 0.7978846, %v874_v31 }
 0x189   :  { %v831_v48 = vmul.f32 0.044715, %v784_v21  ;;  %v788_v56 = vadd.f32 %v787_v27, %v3988_v26  ;;  %v877_v36 = vadd.f32 %v861_v16, %v3994_v52  ;;  %v891_v61 = vmul.f32 0.7978846, %v875_v28 }
 0x18a   :  { %v846_v40 = vmul.f32 %v830_v32, %v3999_v17  ;;  %v832_v44 = vmul.f32 0.044715, %v4005_v8  ;;  %v892_v53 = vmul.f32 0.7978846, %v876_v19  ;;  %3499 = vtanh.f32 %v890_v34 }
 0x18b   :  { %v847_v20 = vmul.f32 %v831_v48, %v784_v21  ;;  %v833_v33 = vmul.f32 0.044715, %v788_v56  ;;  %v893_v54 = vmul.f32 0.7978846, %v877_v36  ;;  %3501 = vtanh.f32 %v891_v61 }
 0x18c   :  { %v862_v58 = vmul.f32 %v846_v40, %v3999_v17  ;;  %v848_v60 = vmul.f32 %v832_v44, %v4005_v8  ;;  %3503 = vtanh.f32 %v892_v53  ;;  %v810_v15 = vmul.f32 0.5, %v772_v43 }
 0x18d   :  { %v863_v62 = vmul.f32 %v847_v20, %v784_v21  ;;  %v849_v63 = vmul.f32 %v833_v33, %v788_v56  ;;  %v791_v1 = vpop.f32.mrb[24].mxu1  ;;  %3505 = vtanh.f32 %v893_v54  ;;  %v812_v34 = vmul.f32 0.5, %v776_v50 }
 0x18e   :  { %v864_v4 = vmul.f32 %v848_v60, %v4005_v8  ;;  %v4015_v5 = vadd.f32 %v791_v1, %v3985_v39  ;;  %v793_v12 = vpop.f32.mrb[25].mxu1  ;;  %v878_v28 = vadd.f32 %v862_v58, %v3999_v17 }
 0x18f   :  { %v865_v18 = vmul.f32 %v849_v63, %v788_v56  ;;  %v4018_v31 = vadd.f32 %v793_v12, %v3988_v26  ;;  %v795_v23 = vpop.f32.mrb[26].mxu1  ;;  %v879_v16 = vadd.f32 %v863_v62, %v784_v21  ;;  %v813_v62 = vmul.f32 0.5, %v3994_v52 }
 0x190   :  { %v834_v32 = vmul.f32 0.044715, %v4015_v5  ;;  %v4023_v27 = vadd.f32 %v795_v23, %v3985_v39  ;;  %v797_v19 = vpop.f32.mrb[27].mxu1  ;;  %v880_v48 = vadd.f32 %v864_v4, %v4005_v8  ;;  %v894_v53 = vmul.f32 0.7978846, %v878_v28 }
 0x191   :  { %v835_v47 = vmul.f32 0.044715, %v4018_v31  ;;  %v4028_v43 = vadd.f32 %v797_v19, %v3988_v26  ;;  %v881_v36 = vadd.f32 %v865_v18, %v788_v56  ;;  %v895_v61 = vmul.f32 0.7978846, %v879_v16 }
 0x192   :  { %v850_v40 = vmul.f32 %v834_v32, %v4015_v5  ;;  %v836_v44 = vmul.f32 0.044715, %v4023_v27  ;;  %v896_v20 = vmul.f32 0.7978846, %v880_v48  ;;  %v4036_v63 = vmul.f32 0.5, %v784_v21 }
 0x193   :  { %v851_v33 = vmul.f32 %v835_v47, %v4018_v31  ;;  %v837_v54 = vmul.f32 0.044715, %v4028_v43  ;;  %v897_v50 = vmul.f32 0.7978846, %v881_v36  ;;  %3507 = vtanh.f32 %v895_v61 }
 0x194   :  { %v3500_v58 = vpop.eup %3499  ;;  %v852_v60 = vmul.f32 %v836_v44, %v4023_v27  ;;  %3509 = vtanh.f32 %v894_v53  ;;  %v4039_v23 = vmul.f32 0.5, %v788_v56  ;;  %v866_v21 = vmul.f32 %v850_v40, %v4015_v5 }
 0x195   :  { %v3502_v1 = vpop.eup %3501  ;;  %v853_v4 = vmul.f32 %v837_v54, %v4028_v43  ;;  %v801_v12 = vpop.f32.mrb[28].mxu1  ;;  %v922_v18 = vadd.f32 1.0, %v3500_v58  ;;  %3511 = vtanh.f32 %v897_v50  ;;  %v867_v28 = vmul.f32 %v851_v33, %v4018_v31 }
 0x196   :  { %v3504_v16 = vpop.eup %3503  ;;  %v4043_v32 = vadd.f32 %v801_v12, %v3985_v39  ;;  %v803_v19 = vpop.f32.mrb[29].mxu1  ;;  %v923_v48 = vadd.f32 1.0, %v3502_v1  ;;  %3513 = vtanh.f32 %v896_v20  ;;  %v868_v44 = vmul.f32 %v852_v60, %v4023_v27 }
 0x197   :  { %v3506_v52 = vpop.eup %3505  ;;  %v869_v47 = vmul.f32 %v853_v4, %v4028_v43  ;;  %v4048_v36 = vadd.f32 %v803_v19, %v3988_v26  ;;  %v805_v56 = vpop.f32.mrb[30].mxu1  ;;  %v924_v61 = vadd.f32 1.0, %v3504_v16  ;;  %v938_v58 = vmul.f32 %v922_v18, %v810_v15 }
 0x198   :  { %v838_v53 = vmul.f32 0.044715, %v4043_v32  ;;  %v4053_v33 = vadd.f32 %v805_v56, %v3985_v39  ;;  %v807_v54 = vpop.f32.mrb[31].mxu1  ;;  %v925_v50 = vadd.f32 1.0, %v3506_v52  ;;  %v939_v12 = vmul.f32 %v923_v48, %v811_v13 }
 0x199   :  { %v839_v20 = vmul.f32 0.044715, %v4048_v36  ;;  %v4057_v40 = vadd.f32 %v807_v54, %v3988_v26  ;;  %v940_v1 = vmul.f32 %v924_v61, %v812_v34  ;;  %v883_v60 = vadd.f32 %v867_v28, %v4018_v31  ;;  %v3323_v26 = vld [vmem:[#allocation4] ss:$8 sps:$4 sm:$0xff]   ;;  %v3328_v28 = vld [vmem:[#allocation4 + $0x14] ss:$8 sps:$4 sm:$0xff]  }
 0x19a   :  { %v840_v4 = vmul.f32 0.044715, %v4053_v33  ;;  %v941_v16 = vmul.f32 %v925_v50, %v813_v62  ;;  %v885_v52 = vadd.f32 %v869_v47, %v4028_v43  ;;  %v854_v38 = vmul.f32 %v838_v53, %v4043_v32 }
 0x19b   :  { %v855_v19 = vmul.f32 %v839_v20, %v4048_v36  ;;  %v841_v39 = vmul.f32 0.044715, %v4057_v40  ;;  %v954_v56 = vpack.c.bf16 %v940_v1, %v938_v58  ;;  %v814_v15 = vmul.f32 0.5, %v3999_v17 }
 0x19c   :  { %v955_v49 = vpack.c.bf16 %v941_v16, %v939_v12  ;;  %v899_v34 = vmul.f32 0.7978846, %v883_v60  ;;  %v856_v13 = vmul.f32 %v840_v4, %v4053_v33  ;;  %v816_v48 = vmul.f32 0.5, %v4005_v8  ;;  %v3326_v12 = vld [vmem:[#allocation4 + $0x10] ss:$8 sps:$4 sm:$0xff]  }
 0x19d   :  { %v3508_v18 = vpop.eup %3507  ;;  %v857_v62 = vmul.f32 %v841_v39, %v4057_v40  ;;  %v901_v61 = vmul.f32 0.7978846, %v885_v52  ;;  %v871_v50 = vmul.f32 %v855_v19, %v4048_v36  ;;  %v882_v53 = vadd.f32 %v866_v21, %v4015_v5  ;;  %v3331_v21 = vld [vmem:[#allocation4 + $0x24] ss:$8 sps:$4 sm:$0xff]  }
 0x19e   :  { %v3510_v54 = vpop.eup %3509  ;;  %1186 = vmatprep.mubr.bf16.mxu0 %v955_v49  ;;  %v927_v47 = vadd.f32 1.0, %v3508_v18  ;;  %3515 = vtanh.f32 %v899_v34  ;;  %v884_v1 = vadd.f32 %v868_v44, %v4023_v27  ;;  %v870_v8 = vmul.f32 %v854_v38, %v4043_v32 }
 0x19f   :  { %v3512_v20 = vpop.eup %3511  ;;  %v873_v17 = vmul.f32 %v857_v62, %v4057_v40  ;;  %1187 = vmatmul.mubr.bf16.vlgmr.msra.gmra.mrb[0].mxu0 %v954_v56  ;;  %v926_v58 = vadd.f32 1.0, %v3510_v54  ;;  %3517 = vtanh.f32 %v901_v61  ;;  %v898_v60 = vmul.f32 0.7978846, %v882_v53  ;;  %v3332_v53 = vld [vmem:[#allocation4 + $0x30] ss:$8 sps:$4 sm:$0xff]  }
 0x1a0   :  { %v3514_v4 = vpop.eup %3513  ;;  %1388 = vmatpush1.bf16.msra.mxu0 %v3323_v26  ;;  %v929_v16 = vadd.f32 1.0, %v3512_v20  ;;  %v943_v49 = vmul.f32 %v927_v47, %v4036_v63  ;;  %v872_v19 = vmul.f32 %v856_v13, %v4053_v33  ;;  %v900_v56 = vmul.f32 0.7978846, %v884_v1  ;;  %v3329_v63 = vld [vmem:[#allocation4 + $0x20] ss:$8 sps:$4 sm:$0xff]  }
 0x1a1   :  { %1389 = vmatprep.subr.bf16.mxu0 %v3328_v28  ;;  %v928_v39 = vadd.f32 1.0, %v3514_v4  ;;  %v942_v52 = vmul.f32 %v926_v58, %v814_v15  ;;  %3519 = vtanh.f32 %v898_v60  ;;  %v887_v44 = vadd.f32 %v871_v50, %v4048_v36  ;;  %v3334_v15 = vld [vmem:[#allocation4 + $0x34] ss:$8 sps:$4 sm:$0xff]   ;;  %v3337_v1 = vld [vmem:[#allocation4 + $0x44] ss:$8 sps:$4 sm:$0xff]  }
 0x1a2   :  { %v945_v34 = vmul.f32 %v929_v16, %v4039_v23  ;;  %v889_v38 = vadd.f32 %v873_v17, %v4057_v40  ;;  %3521 = vtanh.f32 %v900_v56  ;;  %v886_v13 = vadd.f32 %v870_v8, %v4043_v32 }
 0x1a3   :  { %v944_v26 = vmul.f32 %v928_v39, %v816_v48  ;;  %v903_v62 = vmul.f32 0.7978846, %v887_v44  ;;  %v888_v54 = vadd.f32 %v872_v19, %v4053_v33  ;;  %v819_v50 = vmul.f32 0.5, %v4018_v31 }
 0x1a4   :  { %1390 = vmatpush1.bf16.msra.mxu0 %v3326_v12  ;;  %v957_v18 = vpack.c.bf16 %v945_v34, %v943_v49  ;;  %v905_v61 = vmul.f32 0.7978846, %v889_v38  ;;  %v902_v23 = vmul.f32 0.7978846, %v886_v13  ;;  %v821_v20 = vmul.f32 0.5, %v4028_v43 }
 0x1a5   :  { %1391 = vmatprep.subr.bf16.mxu0 %v3331_v21  ;;  %v956_v28 = vpack.c.bf16 %v944_v26, %v942_v52  ;;  %3523 = vtanh.f32 %v903_v62  ;;  %v904_v48 = vmul.f32 0.7978846, %v888_v54  ;;  %v818_v12 = vmul.f32 0.5, %v4015_v5  ;;  %v3335_v49 = vld [vmem:[#allocation4 + $0x40] ss:$8 sps:$4 sm:$0xff]  }
 0x1a6   :  { %1196 = vmatprep.mubr.bf16.mxu0 %v957_v18  ;;  %3525 = vtanh.f32 %v905_v61  ;;  %v820_v60 = vmul.f32 0.5, %v4023_v27  ;;  %v3340_v43 = vld [vmem:[#allocation4 + $0x54] ss:$8 sps:$4 sm:$0xff]   ;;  %v823_v34 = vmul.f32 0.5, %v4048_v36  ;;  %v825_v5 = vmul.f32 0.5, %v4057_v40 }
 0x1a7   :  { %1197 = vmatmul.mubr.bf16.gmra.mrb[4].mxu0 %v956_v28  ;;  %3527 = vtanh.f32 %v902_v23  ;;  %v3338_v18 = vld [vmem:[#allocation4 + $0x50] ss:$8 sps:$4 sm:$0xff]   ;;  %v822_v27 = vmul.f32 0.5, %v4043_v32  ;;  %v3343_v28 = vld [vmem:[#allocation4 + $0x64] ss:$8 sps:$4 sm:$0xff]  }
 0x1a8   :  { %v3516_v47 = vpop.eup %3515  ;;  %1392 = vmatpush1.bf16.msra.mxu0 %v3329_v63  ;;  %3529 = vtanh.f32 %v904_v48  ;;  %v3341_v40 = vld [vmem:[#allocation4 + $0x60] ss:$8 sps:$4 sm:$0xff]   ;;  %v1492_v32 = vld [vmem:[%s4541_s2 + $0x4] sm:$0x3] }
 0x1a9   :  { %v3518_v17 = vpop.eup %3517  ;;  %1393 = vmatprep.subr.bf16.mxu0 %v3334_v15  ;;  %v931_v58 = vadd.f32 1.0, %v3516_v47  ;;  %v824_v15 = vmul.f32 0.5, %v4053_v33  ;;  %v3344_v33 = vld [vmem:[#allocation4 + $0x70] ss:$8 sps:$4 sm:$0xff]  }
 0x1aa   :  { %v933_v4 = vadd.f32 1.0, %v3518_v17  ;;  %v3346_v17 = vld [vmem:[#allocation4 + $0x74] ss:$8 sps:$4 sm:$0xff]  }
 0x1ab   :  { %v947_v8 = vmul.f32 %v931_v58, %v819_v50  ;;  %v3520_v16 = vpop.eup %3519 }
 0x1ac   :  { %1394 = vmatpush1.bf16.msra.mxu0 %v3332_v53  ;;  %v949_v31 = vmul.f32 %v933_v4, %v821_v20  ;;  %v3522_v19 = vpop.eup %3521  ;;  %v930_v21 = vadd.f32 1.0, %v3520_v16  ;;  %v4093_v4 = vrot.slane %v1492_v32, %v3796_v22 }
 0x1ad   :  { %1395 = vmatprep.subr.bf16.mxu0 %v3337_v1  ;;  %v932_v52 = vadd.f32 1.0, %v3522_v19  ;;  %v3349_v1 = vld [vmem:[#allocation4 + $0x84] ss:$8 sps:$4 sm:$0xff]  }
 0x1ae   :  { %v959_v39 = vpack.c.bf16 %v949_v31, %v947_v8  ;;  %v946_v56 = vmul.f32 %v930_v21, %v818_v12  ;;  %v4096_v8 = vrot.slane %v1492_v32, %v3801_v24  ;;  %v3347_v12 = vld [vmem:[#allocation4 + $0x80] ss:$8 sps:$4 sm:$0xff]   ;;  %v3352_v31 = vld [vmem:[#allocation4 + $0x94] ss:$8 sps:$4 sm:$0xff]  }
 0x1af   :  { %v3524_v44 = vpop.eup %3523  ;;  %v948_v38 = vmul.f32 %v932_v52, %v820_v60 }
 0x1b0   :  { %1206 = vmatprep.mubr.bf16.mxu0 %v959_v39  ;;  %1396 = vmatpush1.bf16.msra.mxu0 %v3335_v49  ;;  %v3526_v26 = vpop.eup %3525  ;;  %v935_v63 = vadd.f32 1.0, %v3524_v44 }
 0x1b1   :  { %1397 = vmatprep.subr.bf16.mxu0 %v3340_v43  ;;  %v3528_v62 = vpop.eup %3527  ;;  %v958_v61 = vpack.c.bf16 %v948_v38, %v946_v56  ;;  %v937_v13 = vadd.f32 1.0, %v3526_v26  ;;  %v3350_v56 = vld [vmem:[#allocation4 + $0x90] ss:$8 sps:$4 sm:$0xff]  }
 0x1b2   :  { %v3530_v54 = vpop.eup %3529  ;;  %v951_v36 = vmul.f32 %v935_v63, %v823_v34  ;;  %v934_v23 = vadd.f32 1.0, %v3528_v62  ;;  %v3353_v63 = vld [vmem:[#allocation4 + $0xa0] ss:$8 sps:$4 sm:$0xff]  }
 0x1b3   :  { %1207 = vmatmul.mubr.bf16.gmra.mrb[8].mxu0 %v958_v61  ;;  %v953_v50 = vmul.f32 %v937_v13, %v825_v5  ;;  %v936_v48 = vadd.f32 1.0, %v3530_v54  ;;  %v3358_v13 = vld [vmem:[#allocation4 + $0xb4] ss:$8 sps:$4 sm:$0xff]  }
 0x1b4   :  { %1398 = vmatpush1.bf16.msra.mxu0 %v3338_v18  ;;  %v950_v47 = vmul.f32 %v934_v23, %v822_v27 }
 0x1b5   :  { %v961_v53 = vpack.c.bf16 %v953_v50, %v951_v36  ;;  %1399 = vmatprep.subr.bf16.mxu0 %v3343_v28  ;;  %v952_v20 = vmul.f32 %v936_v48, %v824_v15 }
 0x1b7   :  { %1216 = vmatprep.mubr.bf16.mxu0 %v961_v53  ;;  %v960_v58 = vpack.c.bf16 %v952_v20, %v950_v47 }
 0x1b8   :  { %1400 = vmatpush1.bf16.msra.mxu0 %v3341_v40 }
 0x1b9   :  { %1401 = vmatprep.subr.bf16.mxu0 %v3346_v17 }
 0x1bb   :  { %1217 = vmatmul.mubr.bf16.gmra.mrb[12].mxu0 %v960_v58  ;;  %v3356_v58 = vld [vmem:[#allocation4 + $0xb0] ss:$8 sps:$4 sm:$0xff]  }
 0x1bc   :  { %1419 = vmatprep.mubr.bf16.mxu0 %v494_v14  ;;  %1402 = vmatpush1.bf16.msra.mxu0 %v3344_v33  ;;  %v3355_v14 = vld [vmem:[#allocation4 + $0xa4] ss:$8 sps:$4 sm:$0xff]  }
 0x1bd   :  { %v1698_v16 = vpop.f32.mrb[32].mxu1  ;;  %1403 = vmatprep.subr.bf16.mxu0 %v3349_v1 }
 0x1be   :  { %v1699_v49 = vadd.f32 %v1698_v16, %v4093_v4  ;;  %v1700_v60 = vpop.f32.mrb[33].mxu1 }
 0x1bf   :  { %v4103_v19 = vadd.f32 %v1700_v60, %v4096_v8  ;;  %v1702_v21 = vpop.f32.mrb[34].mxu1 }
 0x1c0   :  { %v1753_v43 = vmul.f32 0.044715, %v1699_v49  ;;  %v1703_v39 = vadd.f32 %v1702_v21, %v4093_v4  ;;  %v1704_v52 = vpop.f32.mrb[35].mxu1  ;;  %1404 = vmatpush1.bf16.msra.mxu0 %v3347_v12 }
 0x1c1   :  { %v1754_v6 = vmul.f32 0.044715, %v4103_v19  ;;  %v4108_v25 = vadd.f32 %v1704_v52, %v4096_v8  ;;  %1405 = vmatprep.subr.bf16.mxu0 %v3352_v31  ;;  %v3361_v31 = vld [vmem:[#allocation4 + $0xc4] ss:$8 sps:$4 sm:$0xff]  }
 0x1c2   :  { %v1769_v34 = vmul.f32 %v1753_v43, %v1699_v49  ;;  %v1755_v44 = vmul.f32 0.044715, %v1703_v39 }
 0x1c3   :  { %v1770_v38 = vmul.f32 %v1754_v6, %v4103_v19  ;;  %v1756_v5 = vmul.f32 0.044715, %v4108_v25 }
 0x1c4   :  { %v1785_v26 = vmul.f32 %v1769_v34, %v1699_v49  ;;  %v1771_v18 = vmul.f32 %v1755_v44, %v1703_v39  ;;  %1406 = vmatpush1.bf16.msra.mxu0 %v3350_v56  ;;  %v3359_v44 = vld [vmem:[#allocation4 + $0xc0] ss:$8 sps:$4 sm:$0xff]  }
 0x1c5   :  { %v1786_v27 = vmul.f32 %v1770_v38, %v4103_v19  ;;  %v1772_v62 = vmul.f32 %v1756_v5, %v4108_v25  ;;  %v1708_v61 = vpop.f32.mrb[36].mxu1  ;;  %1407 = vmatprep.subr.bf16.mxu0 %v3355_v14  ;;  %v4134_v38 = vmul.f32 0.5, %v1699_v49 }
 0x1c6   :  { %v1801_v28 = vadd.f32 %v1785_v26, %v1699_v49  ;;  %v1787_v15 = vmul.f32 %v1771_v18, %v1703_v39  ;;  %v4115_v54 = vadd.f32 %v1708_v61, %v4093_v4  ;;  %v1710_v36 = vpop.f32.mrb[37].mxu1  ;;  %v1738_v61 = vmul.f32 0.5, %v4103_v19 }
 0x1c7   :  { %v1788_v23 = vmul.f32 %v1772_v62, %v4108_v25  ;;  %v4119_v50 = vadd.f32 %v1710_v36, %v4096_v8  ;;  %v1712_v48 = vpop.f32.mrb[38].mxu1  ;;  %v1802_v40 = vadd.f32 %v1786_v27, %v4103_v19  ;;  %v4137_v27 = vmul.f32 0.5, %v1703_v39 }
 0x1c8   :  { %v1817_v47 = vmul.f32 0.7978846, %v1801_v28  ;;  %v1803_v53 = vadd.f32 %v1787_v15, %v1703_v39  ;;  %v1757_v20 = vmul.f32 0.044715, %v4115_v54  ;;  %v4124_v17 = vadd.f32 %v1712_v48, %v4093_v4  ;;  %v1714_v32 = vpop.f32.mrb[39].mxu1  ;;  %1408 = vmatpush1.bf16.msra.mxu0 %v3353_v63 }
 0x1c9   :  { %v1758_v33 = vmul.f32 0.044715, %v4119_v50  ;;  %v1804_v1 = vadd.f32 %v1788_v23, %v4108_v25  ;;  %v1818_v12 = vmul.f32 0.7978846, %v1802_v40  ;;  %v1715_v16 = vadd.f32 %v1714_v32, %v4096_v8  ;;  %1409 = vmatprep.subr.bf16.mxu0 %v3358_v13  ;;  %v3364_v63 = vld [vmem:[#allocation4 + $0xd4] ss:$8 sps:$4 sm:$0xff]  }
 0x1ca   :  { %3531 = vtanh.f32 %v1817_v47  ;;  %v1819_v60 = vmul.f32 0.7978846, %v1803_v53  ;;  %v1773_v21 = vmul.f32 %v1757_v20, %v4115_v54  ;;  %v1759_v43 = vmul.f32 0.044715, %v4124_v17  ;;  %v3362_v40 = vld [vmem:[#allocation4 + $0xd0] ss:$8 sps:$4 sm:$0xff]  }
 0x1cb   :  { %v1774_v52 = vmul.f32 %v1758_v33, %v4119_v50  ;;  %v1820_v56 = vmul.f32 0.7978846, %v1804_v1  ;;  %3533 = vtanh.f32 %v1818_v12  ;;  %v1760_v6 = vmul.f32 0.044715, %v1715_v16  ;;  %v3367_v32 = vld [vmem:[#allocation4 + $0xe4] ss:$8 sps:$4 sm:$0xff]  }
 0x1cc   :  { %3535 = vtanh.f32 %v1819_v60  ;;  %v1789_v14 = vmul.f32 %v1773_v21, %v4115_v54  ;;  %v1775_v34 = vmul.f32 %v1759_v43, %v4124_v17  ;;  %1410 = vmatpush1.bf16.msra.mxu0 %v3356_v58  ;;  %v1740_v39 = vmul.f32 0.5, %v4108_v25 }
 0x1cd   :  { %v1790_v5 = vmul.f32 %v1774_v52, %v4119_v50  ;;  %3537 = vtanh.f32 %v1820_v56  ;;  %v1776_v26 = vmul.f32 %v1760_v6, %v1715_v16  ;;  %v1718_v18 = vpop.f32.mrb[40].mxu1  ;;  %1411 = vmatprep.subr.bf16.mxu0 %v3361_v31 }
 0x1ce   :  { %v1791_v62 = vmul.f32 %v1775_v34, %v4124_v17  ;;  %v4142_v13 = vadd.f32 %v1718_v18, %v4093_v4  ;;  %v1720_v28 = vpop.f32.mrb[41].mxu1  ;;  %v1805_v48 = vadd.f32 %v1789_v14, %v4115_v54  ;;  %v4164_v14 = vmul.f32 0.5, %v4119_v50 }
 0x1cf   :  { %v1792_v15 = vmul.f32 %v1776_v26, %v1715_v16  ;;  %v4145_v49 = vadd.f32 %v1720_v28, %v4096_v8  ;;  %v1722_v36 = vpop.f32.mrb[42].mxu1  ;;  %v1806_v23 = vadd.f32 %v1790_v5, %v4119_v50  ;;  %v4166_v34 = vmul.f32 0.5, %v1715_v16  ;;  %v3365_v5 = vld [vmem:[#allocation4 + $0xe0] ss:$8 sps:$4 sm:$0xff]  }
 0x1d0   :  { %v1761_v47 = vmul.f32 0.044715, %v4142_v13  ;;  %v4152_v19 = vadd.f32 %v1722_v36, %v4093_v4  ;;  %v1724_v53 = vpop.f32.mrb[43].mxu1  ;;  %v1807_v20 = vadd.f32 %v1791_v62, %v4124_v17  ;;  %1412 = vmatpush1.bf16.msra.mxu0 %v3359_v44  ;;  %v1821_v31 = vmul.f32 0.7978846, %v1805_v48 }
 0x1d1   :  { %v1762_v58 = vmul.f32 0.044715, %v4145_v49  ;;  %v4157_v33 = vadd.f32 %v1724_v53, %v4096_v8  ;;  %v1808_v1 = vadd.f32 %v1792_v15, %v1715_v16  ;;  %v1822_v12 = vmul.f32 0.7978846, %v1806_v23  ;;  %1413 = vmatprep.subr.bf16.mxu0 %v3364_v63  ;;  %v3370_v15 = vld [vmem:[#allocation4 + $0xf4] ss:$8 sps:$4 sm:$0xff]  }
 0x1d2   :  { %v1763_v25 = vmul.f32 0.044715, %v4152_v19  ;;  %v1823_v60 = vmul.f32 0.7978846, %v1807_v20  ;;  %v1777_v6 = vmul.f32 %v1761_v47, %v4142_v13  ;;  %v1745_v30 = vmul.f32 0.5, %v4142_v13 }
 0x1d3   :  { %v1778_v21 = vmul.f32 %v1762_v58, %v4145_v49  ;;  %v1764_v43 = vmul.f32 0.044715, %v4157_v33  ;;  %v1824_v52 = vmul.f32 0.7978846, %v1808_v1  ;;  %3539 = vtanh.f32 %v1822_v12 }
 0x1d4   :  { %v3532_v56 = vpop.eup %3531  ;;  %3541 = vtanh.f32 %v1821_v31  ;;  %1414 = vmatpush1.bf16.msra.mxu0 %v3362_v40  ;;  %v1779_v26 = vmul.f32 %v1763_v25, %v4152_v19 }
 0x1d5   :  { %v3534_v44 = vpop.eup %3533  ;;  %v1780_v18 = vmul.f32 %v1764_v43, %v4157_v33  ;;  %v1728_v63 = vpop.f32.mrb[44].mxu1  ;;  %v1849_v62 = vadd.f32 1.0, %v3532_v56  ;;  %3543 = vtanh.f32 %v1824_v52  ;;  %1415 = vmatprep.subr.bf16.mxu0 %v3367_v32  ;;  %v1794_v50 = vmul.f32 %v1778_v21, %v4145_v49 }
 0x1d6   :  { %v3536_v28 = vpop.eup %3535  ;;  %v1850_v36 = vadd.f32 1.0, %v3534_v44  ;;  %v4172_v16 = vadd.f32 %v1728_v63, %v4093_v4  ;;  %v1730_v23 = vpop.f32.mrb[45].mxu1  ;;  %3545 = vtanh.f32 %v1823_v60  ;;  %v3368_v60 = vld [vmem:[#allocation4 + $0xf0] ss:$8 sps:$4 sm:$0xff]   ;;  %v1793_v21 = vmul.f32 %v1777_v6, %v4142_v13 }
 0x1d7   :  { %v3538_v48 = vpop.eup %3537  ;;  %v1796_v40 = vmul.f32 %v1780_v18, %v4157_v33  ;;  %v4176_v47 = vadd.f32 %v1730_v23, %v4096_v8  ;;  %v1732_v53 = vpop.f32.mrb[46].mxu1  ;;  %v1851_v20 = vadd.f32 1.0, %v3536_v28  ;;  %v4179_v58 = vmul.f32 %v1849_v62, %v4134_v38 }
 0x1d8   :  { %v1852_v32 = vadd.f32 1.0, %v3538_v48  ;;  %v4181_v1 = vmul.f32 %v1850_v36, %v1738_v61  ;;  %v1765_v12 = vmul.f32 0.044715, %v4172_v16  ;;  %v4185_v25 = vadd.f32 %v1732_v53, %v4093_v4  ;;  %v1734_v31 = vpop.f32.mrb[47].mxu1  ;;  %1416 = vmatpush1.bf16.msra.mxu0 %v3365_v5  ;;  %v3373_v61 = vld [vmem:[#allocation4 + $0x204] ss:$8 sps:$4 sm:$0xff]  }
 0x1d9   :  { %v1766_v43 = vmul.f32 0.044715, %v4176_v47  ;;  %v4190_v52 = vadd.f32 %v1734_v31, %v4096_v8  ;;  %v4193_v38 = vmul.f32 %v1851_v20, %v4137_v27  ;;  %1417 = vmatprep.subr.bf16.mxu0 %v3370_v15  ;;  %v1795_v4 = vmul.f32 %v1779_v26, %v4152_v19  ;;  %v3371_v15 = vld [vmem:[#allocation4 + $0x200] ss:$8 sps:$4 sm:$0xff]  }
 0x1da   :  { %v4195_v56 = vmul.f32 %v1852_v32, %v1740_v39  ;;  %v1767_v44 = vmul.f32 0.044715, %v4185_v25  ;;  %v1810_v5 = vadd.f32 %v1794_v50, %v4145_v49  ;;  %v1812_v27 = vadd.f32 %v1796_v40, %v4157_v33  ;;  %v3376_v40 = vld [vmem:[#allocation4 + $0x214] ss:$8 sps:$4 sm:$0xff]  }
 0x1db   :  { %v1782_v6 = vmul.f32 %v1766_v43, %v4176_v47  ;;  %v1768_v18 = vmul.f32 0.044715, %v4190_v52  ;;  %v1881_v8 = vpack.c.bf16 %v4193_v38, %v4179_v58  ;;  %v1781_v39 = vmul.f32 %v1765_v12, %v4172_v16  ;;  %v3427_v38 = vld [vmem:[#allocation4 + $0x324] ss:$8 sps:$4 sm:$0xff]  }
 0x1dc   :  { %v1882_v63 = vpack.c.bf16 %v4195_v56, %v4181_v1  ;;  %v1741_v26 = vmul.f32 0.5, %v4115_v54  ;;  %v1826_v62 = vmul.f32 0.7978846, %v1810_v5  ;;  %1418 = vmatpush1.bf16.msra.mxu0 %v3368_v60  ;;  %v1783_v36 = vmul.f32 %v1767_v44, %v4185_v25 }
 0x1dd   :  { %v3540_v28 = vpop.eup %3539  ;;  %v1784_v50 = vmul.f32 %v1768_v18, %v4190_v52  ;;  %v1743_v23 = vmul.f32 0.5, %v4124_v17  ;;  %v1828_v48 = vmul.f32 0.7978846, %v1812_v27  ;;  %2081 = vmatprep.subr.bf16.mxu0 %v3373_v61  ;;  %v1798_v20 = vmul.f32 %v1782_v6, %v4176_v47 }
 0x1de   :  { %v3542_v53 = vpop.eup %3541  ;;  %v1854_v32 = vadd.f32 1.0, %v3540_v28  ;;  %3547 = vtanh.f32 %v1826_v62  ;;  %v1809_v54 = vadd.f32 %v1793_v21, %v4142_v13  ;;  %v1811_v43 = vadd.f32 %v1795_v4, %v4152_v19  ;;  %v3374_v21 = vld [vmem:[#allocation4 + $0x210] ss:$8 sps:$4 sm:$0xff]   ;;  %v3377_v28 = vld [vmem:[#allocation4 + $0x220] ss:$8 sps:$4 sm:$0xff]  }
 0x1df   :  { %v3544_v12 = vpop.eup %3543  ;;  %v1800_v31 = vmul.f32 %v1784_v50, %v4190_v52  ;;  %v1853_v60 = vadd.f32 1.0, %v3542_v53  ;;  %3549 = vtanh.f32 %v1828_v48  ;;  %1420 = vmatmul.mubr.bf16.vlgmr.msra.gmra.mrb[0].mxu0 %v493_v10  ;;  %v1797_v17 = vmul.f32 %v1781_v39, %v4172_v16 }
 0x1e0   :  { %v3546_v44 = vpop.eup %3545  ;;  %v1856_v61 = vadd.f32 1.0, %v3544_v12  ;;  %v4221_v5 = vmul.f32 %v1854_v32, %v4164_v14  ;;  %v1825_v6 = vmul.f32 0.7978846, %v1809_v54  ;;  %1429 = vmatprep.mubr.bf16.mxu0 %v496_v51  ;;  %2082 = vmatpush1.bf16.msra.mxu0 %v3371_v15  ;;  %v1799_v4 = vmul.f32 %v1783_v36, %v4185_v25  ;;  %v3382_v36 = vld [vmem:[#allocation4 + $0x234] ss:$8 sps:$4 sm:$0xff]  }
 0x1e1   :  { %v1855_v18 = vadd.f32 1.0, %v3546_v44  ;;  %v4227_v27 = vmul.f32 %v1853_v60, %v1741_v26  ;;  %v1827_v0 = vmul.f32 0.7978846, %v1811_v43  ;;  %2083 = vmatprep.subr.bf16.mxu0 %v3376_v40  ;;  %v1814_v14 = vadd.f32 %v1798_v20, %v4176_v47  ;;  %v3380_v32 = vld [vmem:[#allocation4 + $0x230] ss:$8 sps:$4 sm:$0xff]  }
 0x1e2   :  { %v4230_v10 = vmul.f32 %v1856_v61, %v4166_v34  ;;  %3551 = vtanh.f32 %v1825_v6  ;;  %v1816_v39 = vadd.f32 %v1800_v31, %v4190_v52  ;;  %v1813_v62 = vadd.f32 %v1797_v17, %v4172_v16 }
 0x1e3   :  { %v4234_v46 = vmul.f32 %v1855_v18, %v1743_v23  ;;  %3553 = vtanh.f32 %v1827_v0  ;;  %v1830_v51 = vmul.f32 0.7978846, %v1814_v14  ;;  %v1815_v15 = vadd.f32 %v1799_v4, %v4185_v25  ;;  %v3386_v18 = vld [vmem:[#allocation4 + $0x250] ss:$8 sps:$4 sm:$0xff]   ;;  %v3391_v14 = vld [vmem:[#allocation4 + $0x264] ss:$8 sps:$4 sm:$0xff]  }
 0x1e4   :  { %v1884_v42 = vpack.c.bf16 %v4230_v10, %v4221_v5  ;;  %v1832_v26 = vmul.f32 0.7978846, %v1816_v39  ;;  %2084 = vmatpush1.bf16.msra.mxu0 %v3374_v21  ;;  %v1829_v50 = vmul.f32 0.7978846, %v1813_v62  ;;  %v1746_v23 = vmul.f32 0.5, %v4145_v49 }
 0x1e5   :  { %v1883_v34 = vpack.c.bf16 %v4234_v46, %v4227_v27  ;;  %2085 = vmatprep.subr.bf16.mxu0 %v3379_v3  ;;  %3555 = vtanh.f32 %v1830_v51  ;;  %v1831_v48 = vmul.f32 0.7978846, %v1815_v15  ;;  %v1748_v40 = vmul.f32 0.5, %v4157_v33  ;;  %v3385_v49 = vld [vmem:[#allocation4 + $0x244] ss:$8 sps:$4 sm:$0xff]  }
 0x1e6   :  { %3557 = vtanh.f32 %v1832_v26  ;;  %v1747_v33 = vmul.f32 0.5, %v4152_v19  ;;  %v1750_v61 = vmul.f32 0.5, %v4176_v47  ;;  %v1752_v6 = vmul.f32 0.5, %v4190_v52  ;;  %v3389_v26 = vld [vmem:[#allocation4 + $0x260] ss:$8 sps:$4 sm:$0xff]  }
 0x1e7   :  { %1430 = vmatmul.mubr.bf16.gmra.mrb[4].mxu0 %v495_v59  ;;  %3559 = vtanh.f32 %v1829_v50  ;;  %v4545_v4 = vpack.c.bf16 %v3971_v2, %v3967_v45  ;;  %v1749_v3 = vmul.f32 0.5, %v4172_v16  ;;  %v3394_v16 = vld [vmem:[#allocation4 + $0x274] ss:$8 sps:$4 sm:$0xff]  }
 0x1e8   :  { %v3548_v53 = vpop.eup %3547  ;;  %1439 = vmatprep.mubr.bf16.mxu0 %v498_v11  ;;  %2086 = vmatpush1.bf16.msra.mxu0 %v3377_v28  ;;  %3561 = vtanh.f32 %v1831_v48  ;;  %v3388_v11 = vld [vmem:[#allocation4 + $0x254] ss:$8 sps:$4 sm:$0xff]   ;;  %v3397_v48 = vld [vmem:[#allocation4 + $0x284] ss:$8 sps:$4 sm:$0xff]  }
 0x1e9   :  { %v3550_v20 = vpop.eup %3549  ;;  %v1858_v54 = vadd.f32 1.0, %v3548_v53  ;;  %2087 = vmatprep.subr.bf16.mxu0 %v3382_v36  ;;  %v4546_v36 = vpack.c.bf16 %v3977_v57, %v3973_v37  ;;  %v3395_v37 = vld [vmem:[#allocation4 + $0x280] ss:$8 sps:$4 sm:$0xff]  }
 0x1ea   :  { %v1860_v12 = vadd.f32 1.0, %v3550_v20  ;;  %v3400_v20 = vld [vmem:[#allocation4 + $0x294] ss:$8 sps:$4 sm:$0xff]  }
 0x1eb   :  { %v4250_v31 = vmul.f32 %v1858_v54, %v1746_v23  ;;  %v3392_v23 = vld [vmem:[#allocation4 + $0x270] ss:$8 sps:$4 sm:$0xff]  }
 0x1ec   :  { %v3552_v55 = vpop.eup %3551  ;;  %v4253_v59 = vmul.f32 %v1860_v12, %v1748_v40  ;;  %2088 = vmatpush1.bf16.msra.mxu0 %v3380_v32 }
 0x1ed   :  { %v3554_v60 = vpop.eup %3553  ;;  %v1857_v9 = vadd.f32 1.0, %v3552_v55  ;;  %2089 = vmatprep.subr.bf16.mxu0 %v3385_v49 }
 0x1ee   :  { %v1886_v43 = vpack.c.bf16 %v4253_v59, %v4250_v31  ;;  %v1859_v44 = vadd.f32 1.0, %v3554_v60  ;;  %v3403_v60 = vld [vmem:[#allocation4 + $0x2a4] ss:$8 sps:$4 sm:$0xff]   ;;  %v3436_v31 = vld [vmem:[#allocation4 + $0x354] ss:$8 sps:$4 sm:$0xff]  }
 0x1ef   :  { %v4258_v17 = vmul.f32 %v1857_v9, %v1745_v30  ;;  %v3556_v13 = vpop.eup %3555  ;;  %1440 = vmatmul.mubr.bf16.gmra.mrb[8].mxu0 %v497_v35  ;;  %v1751_v35 = vmul.f32 0.5, %v4185_v25  ;;  %v2202_v25 = vld [vmem:[%s4541_s2 + $0x6] sm:$0x3]  ;;  %v3398_v30 = vld [vmem:[#allocation4 + $0x290] ss:$8 sps:$4 sm:$0xff]  }
 0x1f0   :  { %v4264_v19 = vmul.f32 %v1859_v44, %v1747_v33  ;;  %v3558_v21 = vpop.eup %3557  ;;  %1449 = vmatprep.mubr.bf16.mxu0 %v4545_v4  ;;  %2090 = vmatpush1.bf16.msra.mxu0 %v3383_v7  ;;  %v1862_v0 = vadd.f32 1.0, %v3556_v13  ;;  %v4296_v53 = vrot.slane %v2202_v25, %v3796_v22  ;;  %v4299_v40 = vrot.slane %v2202_v25, %v3801_v24 }
 0x1f1   :  { %v3560_v47 = vpop.eup %3559  ;;  %2091 = vmatprep.subr.bf16.mxu0 %v3388_v11  ;;  %v1864_v41 = vadd.f32 1.0, %v3558_v21 }
 0x1f2   :  { %v1885_v29 = vpack.c.bf16 %v4264_v19, %v4258_v17  ;;  %v3562_v52 = vpop.eup %3561  ;;  %v4274_v39 = vmul.f32 %v1862_v0, %v1750_v61  ;;  %v1861_v51 = vadd.f32 1.0, %v3560_v47  ;;  %v3406_v0 = vld [vmem:[#allocation4 + $0x2b4] ss:$8 sps:$4 sm:$0xff]  }
 0x1f3   :  { %v4276_v45 = vmul.f32 %v1864_v41, %v1752_v6  ;;  %v1863_v2 = vadd.f32 1.0, %v3562_v52  ;;  %v3401_v6 = vld [vmem:[#allocation4 + $0x2a0] ss:$8 sps:$4 sm:$0xff]  }
 0x1f4   :  { %2092 = vmatpush1.bf16.msra.mxu0 %v3386_v18  ;;  %v4278_v62 = vmul.f32 %v1861_v51, %v1749_v3 }
 0x1f5   :  { %2093 = vmatprep.subr.bf16.mxu0 %v3391_v14  ;;  %v1888_v28 = vpack.c.bf16 %v4276_v45, %v4274_v39  ;;  %v4282_v15 = vmul.f32 %v1863_v2, %v1751_v35  ;;  %v3437_v39 = vld [vmem:[#allocation4 + $0x360] ss:$8 sps:$4 sm:$0xff]  }
 0x1f7   :  { %1450 = vmatmul.mubr.bf16.gmra.mrb[16].mxu0 %v4546_v36  ;;  %v1887_v50 = vpack.c.bf16 %v4282_v15, %v4278_v62  ;;  %v3449_v62 = vld [vmem:[#allocation4 + $0x3a0] ss:$8 sps:$4 sm:$0xff]   ;;  %v3454_v15 = vld [vmem:[#allocation4 + $0x3b4] ss:$8 sps:$4 sm:$0xff]  }
 0x1f8   :  { %2094 = vmatpush1.bf16.msra.mxu0 %v3389_v26  ;;  %2113 = vmatprep.mubr.bf16.mxu0 %v1882_v63 }
 0x1f9   :  { %2095 = vmatprep.subr.bf16.mxu0 %v3394_v16 }
 0x1fc   :  { %2096 = vmatpush1.bf16.msra.mxu0 %v3392_v23 }
 0x1fd   :  { %v2408_v57 = vpop.f32.mrb[48].mxu1  ;;  %2097 = vmatprep.subr.bf16.mxu0 %v3397_v48  ;;  %v3404_v48 = vld [vmem:[#allocation4 + $0x2b0] ss:$8 sps:$4 sm:$0xff]  }
 0x1fe   :  { %v2409_v32 = vadd.f32 %v2408_v57, %v4296_v53  ;;  %v2410_v54 = vpop.f32.mrb[49].mxu1 }
 0x1ff   :  { %v4303_v49 = vadd.f32 %v2410_v54, %v4299_v40  ;;  %v2412_v1 = vpop.f32.mrb[50].mxu1 }
 0x200   :  { %v2463_v56 = vmul.f32 0.044715, %v2409_v32  ;;  %v2413_v63 = vadd.f32 %v2412_v1, %v4296_v53  ;;  %v2414_v12 = vpop.f32.mrb[51].mxu1  ;;  %2098 = vmatpush1.bf16.msra.mxu0 %v3395_v37  ;;  %v3409_v1 = vld [vmem:[#allocation4 + $0x2c4] ss:$8 sps:$4 sm:$0xff]  }
 0x201   :  { %v2464_v55 = vmul.f32 0.044715, %v4303_v49  ;;  %v4308_v33 = vadd.f32 %v2414_v12, %v4299_v40  ;;  %2099 = vmatprep.subr.bf16.mxu0 %v3400_v20 }
 0x202   :  { %v2479_v7 = vmul.f32 %v2463_v56, %v2409_v32  ;;  %v2465_v9 = vmul.f32 0.044715, %v2413_v63 }
 0x203   :  { %v2480_v11 = vmul.f32 %v2464_v55, %v4303_v49  ;;  %v2466_v44 = vmul.f32 0.044715, %v4308_v33 }
 0x204   :  { %v2495_v61 = vmul.f32 %v2479_v7, %v2409_v32  ;;  %v2481_v13 = vmul.f32 %v2465_v9, %v2413_v63  ;;  %2100 = vmatpush1.bf16.msra.mxu0 %v3398_v30 }
 0x205   :  { %v2496_v21 = vmul.f32 %v2480_v11, %v4303_v49  ;;  %v2482_v4 = vmul.f32 %v2466_v44, %v4308_v33  ;;  %v2418_v18 = vpop.f32.mrb[52].mxu1  ;;  %2101 = vmatprep.subr.bf16.mxu0 %v3403_v60  ;;  %v3407_v44 = vld [vmem:[#allocation4 + $0x2c0] ss:$8 sps:$4 sm:$0xff]  }
 0x206   :  { %v2511_v3 = vadd.f32 %v2495_v61, %v2409_v32  ;;  %v2497_v47 = vmul.f32 %v2481_v13, %v2413_v63  ;;  %v4315_v14 = vadd.f32 %v2418_v18, %v4296_v53  ;;  %v2420_v41 = vpop.f32.mrb[53].mxu1  ;;  %v4334_v61 = vmul.f32 0.5, %v2409_v32 }
 0x207   :  { %v2498_v35 = vmul.f32 %v2482_v4, %v4308_v33  ;;  %v4319_v52 = vadd.f32 %v2420_v41, %v4299_v40  ;;  %v2422_v51 = vpop.f32.mrb[54].mxu1  ;;  %v2512_v2 = vadd.f32 %v2496_v21, %v4303_v49  ;;  %v3412_v4 = vld [vmem:[#allocation4 + $0x2d4] ss:$8 sps:$4 sm:$0xff]   ;;  %v4337_v18 = vmul.f32 0.5, %v2413_v63 }
 0x208   :  { %v2527_v26 = vmul.f32 0.7978846, %v2511_v3  ;;  %v2513_v16 = vadd.f32 %v2497_v47, %v2413_v63  ;;  %v2467_v25 = vmul.f32 0.044715, %v4315_v14  ;;  %v4324_v36 = vadd.f32 %v2422_v51, %v4296_v53  ;;  %v2424_v23 = vpop.f32.mrb[55].mxu1  ;;  %2102 = vmatpush1.bf16.msra.mxu0 %v3401_v6 }
 0x209   :  { %v2468_v37 = vmul.f32 0.044715, %v4319_v52  ;;  %v2425_v57 = vadd.f32 %v2424_v23, %v4299_v40  ;;  %v2514_v20 = vadd.f32 %v2498_v35, %v4308_v33  ;;  %v2528_v54 = vmul.f32 0.7978846, %v2512_v2  ;;  %2103 = vmatprep.subr.bf16.mxu0 %v3406_v0 }
 0x20a   :  { %3563 = vtanh.f32 %v2527_v26  ;;  %v2529_v56 = vmul.f32 0.7978846, %v2513_v16  ;;  %v2483_v12 = vmul.f32 %v2467_v25, %v4315_v14  ;;  %v2469_v30 = vmul.f32 0.044715, %v4324_v36  ;;  %v3410_v16 = vld [vmem:[#allocation4 + $0x2d0] ss:$8 sps:$4 sm:$0xff]  }
 0x20b   :  { %v2484_v55 = vmul.f32 %v2468_v37, %v4319_v52  ;;  %v2470_v60 = vmul.f32 0.044715, %v2425_v57  ;;  %v2530_v7 = vmul.f32 0.7978846, %v2514_v20  ;;  %3565 = vtanh.f32 %v2528_v54  ;;  %v3415_v37 = vld [vmem:[#allocation4 + $0x2e4] ss:$8 sps:$4 sm:$0xff]  }
 0x20c   :  { %3567 = vtanh.f32 %v2529_v56  ;;  %v2499_v9 = vmul.f32 %v2483_v12, %v4315_v14  ;;  %v2485_v11 = vmul.f32 %v2469_v30, %v4324_v36  ;;  %2104 = vmatpush1.bf16.msra.mxu0 %v3404_v48  ;;  %v2448_v41 = vmul.f32 0.5, %v4303_v49 }
 0x20d   :  { %v2500_v13 = vmul.f32 %v2484_v55, %v4319_v52  ;;  %v2486_v6 = vmul.f32 %v2470_v60, %v2425_v57  ;;  %v2428_v21 = vpop.f32.mrb[56].mxu1  ;;  %3569 = vtanh.f32 %v2530_v7  ;;  %2105 = vmatprep.subr.bf16.mxu0 %v3409_v1  ;;  %v2450_v48 = vmul.f32 0.5, %v4308_v33 }
 0x20e   :  { %v2501_v0 = vmul.f32 %v2485_v11, %v4324_v36  ;;  %v4341_v3 = vadd.f32 %v2428_v21, %v4296_v53  ;;  %v2430_v47 = vpop.f32.mrb[57].mxu1  ;;  %v2515_v26 = vadd.f32 %v2499_v9, %v4315_v14  ;;  %v3413_v21 = vld [vmem:[#allocation4 + $0x2e0] ss:$8 sps:$4 sm:$0xff]  }
 0x20f   :  { %v2502_v35 = vmul.f32 %v2486_v6, %v2425_v57  ;;  %v4345_v32 = vadd.f32 %v2430_v47, %v4299_v40  ;;  %v2432_v51 = vpop.f32.mrb[58].mxu1  ;;  %v2516_v2 = vadd.f32 %v2500_v13, %v4319_v52  ;;  %v4366_v13 = vmul.f32 0.5, %v2425_v57 }
 0x210   :  { %v2471_v63 = vmul.f32 0.044715, %v4341_v3  ;;  %v4351_v25 = vadd.f32 %v2432_v51, %v4296_v53  ;;  %v2434_v23 = vpop.f32.mrb[59].mxu1  ;;  %v2517_v49 = vadd.f32 %v2501_v0, %v4324_v36  ;;  %2106 = vmatpush1.bf16.msra.mxu0 %v3407_v44  ;;  %v2531_v30 = vmul.f32 0.7978846, %v2515_v26 }
 0x211   :  { %v2472_v20 = vmul.f32 0.044715, %v4345_v32  ;;  %v4357_v54 = vadd.f32 %v2434_v23, %v4299_v40  ;;  %v2518_v1 = vadd.f32 %v2502_v35, %v2425_v57  ;;  %v2532_v56 = vmul.f32 0.7978846, %v2516_v2  ;;  %2107 = vmatprep.subr.bf16.mxu0 %v3412_v4  ;;  %v3418_v2 = vld [vmem:[#allocation4 + $0x2f4] ss:$8 sps:$4 sm:$0xff]  }
 0x212   :  { %v2473_v12 = vmul.f32 0.044715, %v4351_v25  ;;  %v2533_v55 = vmul.f32 0.7978846, %v2517_v49  ;;  %v2487_v11 = vmul.f32 %v2471_v63, %v4341_v3  ;;  %v4364_v44 = vmul.f32 0.5, %v4319_v52 }
 0x213   :  { %v2488_v60 = vmul.f32 %v2472_v20, %v4345_v32  ;;  %v2474_v33 = vmul.f32 0.044715, %v4357_v54  ;;  %v2534_v7 = vmul.f32 0.7978846, %v2518_v1  ;;  %3571 = vtanh.f32 %v2532_v56 }
 0x214   :  { %v3564_v9 = vpop.eup %3563  ;;  %3573 = vtanh.f32 %v2531_v30  ;;  %2108 = vmatpush1.bf16.msra.mxu0 %v3410_v16  ;;  %v2489_v4 = vmul.f32 %v2473_v12, %v4351_v25  ;;  %v2455_v27 = vmul.f32 0.5, %v4341_v3 }
 0x215   :  { %v3566_v6 = vpop.eup %3565  ;;  %v2490_v0 = vmul.f32 %v2474_v33, %v4357_v54  ;;  %v2438_v47 = vpop.f32.mrb[60].mxu1  ;;  %v2559_v35 = vadd.f32 1.0, %v3564_v9  ;;  %3575 = vtanh.f32 %v2534_v7  ;;  %2109 = vmatprep.subr.bf16.mxu0 %v3415_v37  ;;  %v2504_v26 = vmul.f32 %v2488_v60, %v4345_v32 }
 0x216   :  { %v3568_v51 = vpop.eup %3567  ;;  %v4372_v52 = vadd.f32 %v2438_v47, %v4296_v53  ;;  %v2440_v57 = vpop.f32.mrb[61].mxu1  ;;  %v2560_v63 = vadd.f32 1.0, %v3566_v6  ;;  %3577 = vtanh.f32 %v2533_v55  ;;  %v3416_v55 = vld [vmem:[#allocation4 + $0x2f0] ss:$8 sps:$4 sm:$0xff]   ;;  %v2503_v7 = vmul.f32 %v2487_v11, %v4341_v3 }
 0x217   :  { %v3570_v16 = vpop.eup %3569  ;;  %v2506_v23 = vmul.f32 %v2490_v0, %v4357_v54  ;;  %v4376_v49 = vadd.f32 %v2440_v57, %v4299_v40  ;;  %v2442_v20 = vpop.f32.mrb[62].mxu1  ;;  %v2561_v1 = vadd.f32 1.0, %v3568_v51  ;;  %v4379_v56 = vmul.f32 %v2559_v35, %v4334_v61  ;;  %v3421_v0 = vld [vmem:[#allocation4 + $0x304] ss:$8 sps:$4 sm:$0xff]  }
 0x218   :  { %v2475_v37 = vmul.f32 0.044715, %v4372_v52  ;;  %v4383_v12 = vadd.f32 %v2442_v20, %v4296_v53  ;;  %v2444_v30 = vpop.f32.mrb[63].mxu1  ;;  %v2562_v60 = vadd.f32 1.0, %v3570_v16  ;;  %v4385_v33 = vmul.f32 %v2560_v63, %v2448_v41  ;;  %2110 = vmatpush1.bf16.msra.mxu0 %v3413_v21 }
 0x219   :  { %v2476_v9 = vmul.f32 0.044715, %v4376_v49  ;;  %v4390_v6 = vadd.f32 %v2444_v30, %v4299_v40  ;;  %v4393_v61 = vmul.f32 %v2561_v1, %v4337_v18  ;;  %2111 = vmatprep.subr.bf16.mxu0 %v3418_v2  ;;  %v2505_v53 = vmul.f32 %v2489_v4, %v4351_v25 }
 0x21a   :  { %v2477_v47 = vmul.f32 0.044715, %v4383_v12  ;;  %v4397_v41 = vmul.f32 %v2562_v60, %v2450_v48  ;;  %v2520_v21 = vadd.f32 %v2504_v26, %v4345_v32  ;;  %v2522_v18 = vadd.f32 %v2506_v23, %v4357_v54  ;;  %v3419_v26 = vld [vmem:[#allocation4 + $0x300] ss:$8 sps:$4 sm:$0xff]   ;;  %v3424_v23 = vld [vmem:[#allocation4 + $0x314] ss:$8 sps:$4 sm:$0xff]  }
 0x21b   :  { %v2492_v11 = vmul.f32 %v2476_v9, %v4376_v49  ;;  %v2478_v35 = vmul.f32 0.044715, %v4390_v6  ;;  %v2591_v40 = vpack.c.bf16 %v4393_v61, %v4379_v56  ;;  %v2491_v51 = vmul.f32 %v2475_v37, %v4372_v52 }
 0x21c   :  { %v2592_v4 = vpack.c.bf16 %v4397_v41, %v4385_v33  ;;  %v2451_v2 = vmul.f32 0.5, %v4315_v14  ;;  %v2536_v48 = vmul.f32 0.7978846, %v2520_v21  ;;  %2112 = vmatpush1.bf16.msra.mxu0 %v3416_v55  ;;  %v2493_v63 = vmul.f32 %v2477_v47, %v4383_v12  ;;  %v3455_v33 = vld [vmem:[#allocation4 + $0x3c0] ss:$8 sps:$4 sm:$0xff]  }
 0x21d   :  { %v3572_v57 = vpop.eup %3571  ;;  %v2494_v16 = vmul.f32 %v2478_v35, %v4390_v6  ;;  %v2453_v20 = vmul.f32 0.5, %v4324_v36  ;;  %v2538_v1 = vmul.f32 0.7978846, %v2522_v18  ;;  %2791 = vmatprep.subr.bf16.mxu0 %v3421_v0  ;;  %v2508_v37 = vmul.f32 %v2492_v11, %v4376_v49  ;;  %v3460_v41 = vld [vmem:[#allocation4 + $0x3d4] ss:$8 sps:$4 sm:$0xff]  }
 0x21e   :  { %v3574_v30 = vpop.eup %3573  ;;  %v2564_v60 = vadd.f32 1.0, %v3572_v57  ;;  %3579 = vtanh.f32 %v2536_v48  ;;  %v2519_v14 = vadd.f32 %v2503_v7, %v4341_v3  ;;  %v2521_v47 = vadd.f32 %v2505_v53, %v4351_v25  ;;  %v3422_v7 = vld [vmem:[#allocation4 + $0x310] ss:$8 sps:$4 sm:$0xff]  }
 0x21f   :  { %v3576_v9 = vpop.eup %3575  ;;  %v2510_v55 = vmul.f32 %v2494_v16, %v4390_v6  ;;  %v2563_v21 = vadd.f32 1.0, %v3574_v30  ;;  %3581 = vtanh.f32 %v2538_v1  ;;  %2114 = vmatmul.mubr.bf16.vlgmr.msra.gmra.mrb[0].mxu0 %v1881_v8  ;;  %v2507_v36 = vmul.f32 %v2491_v51, %v4372_v52  ;;  %v3430_v1 = vld [vmem:[#allocation4 + $0x334] ss:$8 sps:$4 sm:$0xff]  }
 0x220   :  { %v3578_v35 = vpop.eup %3577  ;;  %v2566_v0 = vadd.f32 1.0, %v3576_v9  ;;  %v4421_v11 = vmul.f32 %v2564_v60, %v4364_v44  ;;  %v2535_v18 = vmul.f32 0.7978846, %v2519_v14  ;;  %2792 = vmatpush1.bf16.msra.mxu0 %v3419_v26  ;;  %2123 = vmatprep.mubr.bf16.mxu0 %v1884_v42  ;;  %v2509_v53 = vmul.f32 %v2493_v63, %v4383_v12  ;;  %v3425_v63 = vld [vmem:[#allocation4 + $0x320] ss:$8 sps:$4 sm:$0xff]  }
 0x221   :  { %v2565_v48 = vadd.f32 1.0, %v3578_v35  ;;  %v4427_v57 = vmul.f32 %v2563_v21, %v2451_v2  ;;  %v2537_v58 = vmul.f32 0.7978846, %v2521_v47  ;;  %2793 = vmatprep.subr.bf16.mxu0 %v3424_v23  ;;  %v2524_v44 = vadd.f32 %v2508_v37, %v4376_v49  ;;  %v3428_v9 = vld [vmem:[#allocation4 + $0x330] ss:$8 sps:$4 sm:$0xff]  }
 0x222   :  { %v4430_v8 = vmul.f32 %v2566_v0, %v4366_v13  ;;  %3583 = vtanh.f32 %v2535_v18  ;;  %v2526_v51 = vadd.f32 %v2510_v55, %v4390_v6  ;;  %v2523_v2 = vadd.f32 %v2507_v36, %v4372_v52  ;;  %v3431_v36 = vld [vmem:[#allocation4 + $0x340] ss:$8 sps:$4 sm:$0xff]  }
 0x223   :  { %v4434_v26 = vmul.f32 %v2565_v48, %v2453_v20  ;;  %3585 = vtanh.f32 %v2537_v58  ;;  %v2540_v10 = vmul.f32 0.7978846, %v2524_v44  ;;  %v2525_v16 = vadd.f32 %v2509_v53, %v4383_v12  ;;  %v3434_v58 = vld [vmem:[#allocation4 + $0x350] ss:$8 sps:$4 sm:$0xff]  }
 0x224   :  { %v2594_v5 = vpack.c.bf16 %v4430_v8, %v4421_v11  ;;  %v2542_v42 = vmul.f32 0.7978846, %v2526_v51  ;;  %2794 = vmatpush1.bf16.msra.mxu0 %v3422_v7  ;;  %v2539_v20 = vmul.f32 0.7978846, %v2523_v2  ;;  %v2456_v30 = vmul.f32 0.5, %v4345_v32 }
 0x225   :  { %v2593_v13 = vpack.c.bf16 %v4434_v26, %v4427_v57  ;;  %2795 = vmatprep.subr.bf16.mxu0 %v3427_v38  ;;  %3587 = vtanh.f32 %v2540_v10  ;;  %v2541_v23 = vmul.f32 0.7978846, %v2525_v16  ;;  %v2458_v60 = vmul.f32 0.5, %v4357_v54  ;;  %v3433_v32 = vld [vmem:[#allocation4 + $0x344] ss:$8 sps:$4 sm:$0xff]  }
 0x226   :  { %3589 = vtanh.f32 %v2542_v42  ;;  %v2457_v54 = vmul.f32 0.5, %v4351_v25  ;;  %v2460_v7 = vmul.f32 0.5, %v4376_v49  ;;  %v2462_v53 = vmul.f32 0.5, %v4390_v6  ;;  %v3439_v51 = vld [vmem:[#allocation4 + $0x364] ss:$8 sps:$4 sm:$0xff]  }
 0x227   :  { %2124 = vmatmul.mubr.bf16.gmra.mrb[4].mxu0 %v1883_v34  ;;  %3591 = vtanh.f32 %v2539_v20  ;;  %v2459_v44 = vmul.f32 0.5, %v4372_v52  ;;  %v3440_v20 = vld [vmem:[#allocation4 + $0x370] ss:$8 sps:$4 sm:$0xff]  }
 0x228   :  { %v3580_v37 = vpop.eup %3579  ;;  %2796 = vmatpush1.bf16.msra.mxu0 %v3425_v63  ;;  %2133 = vmatprep.mubr.bf16.mxu0 %v1886_v43  ;;  %3593 = vtanh.f32 %v2541_v23  ;;  %v3448_v23 = vld [vmem:[#allocation4 + $0x394] ss:$8 sps:$4 sm:$0xff]  }
 0x229   :  { %v3582_v14 = vpop.eup %3581  ;;  %v2568_v55 = vadd.f32 1.0, %v3580_v37  ;;  %2797 = vmatprep.subr.bf16.mxu0 %v3430_v1  ;;  %v3446_v37 = vld [vmem:[#allocation4 + $0x390] ss:$8 sps:$4 sm:$0xff]  }
 0x22a   :  { %v2570_v21 = vadd.f32 1.0, %v3582_v14  ;;  %v3457_v14 = vld [vmem:[#allocation4 + $0x3c4] ss:$8 sps:$4 sm:$0xff]  }
 0x22b   :  { %v4450_v47 = vmul.f32 %v2568_v55, %v2456_v30  ;;  %v3443_v30 = vld [vmem:[#allocation4 + $0x380] ss:$8 sps:$4 sm:$0xff]  }
 0x22c   :  { %v3584_v46 = vpop.eup %3583  ;;  %v4453_v34 = vmul.f32 %v2570_v21, %v2458_v60  ;;  %2798 = vmatpush1.bf16.msra.mxu0 %v3428_v9  ;;  %v3451_v60 = vld [vmem:[#allocation4 + $0x3a4] ss:$8 sps:$4 sm:$0xff]   ;;  %v3461_v55 = vld [vmem:[#allocation4 + $0x3e0] ss:$8 sps:$4 sm:$0xff]   ;;  %v3464_v21 = vld [vmem:[#allocation4 + $0x3f0] ss:$8 sps:$4 sm:$0xff]  }
 0x22d   :  { %v3586_v35 = vpop.eup %3585  ;;  %v2567_v0 = vadd.f32 1.0, %v3584_v46  ;;  %2799 = vmatprep.subr.bf16.mxu0 %v3433_v32  ;;  %v3463_v9 = vld [vmem:[#allocation4 + $0x3e4] ss:$8 sps:$4 sm:$0xff]   ;;  %v3466_v32 = vld [vmem:[#allocation4 + $0x3f4] ss:$8 sps:$4 sm:$0xff]  }
 0x22e   :  { %v2596_v59 = vpack.c.bf16 %v4453_v34, %v4450_v47  ;;  %v2569_v43 = vadd.f32 1.0, %v3586_v35  ;;  %v2880_v34 = vld [vmem:[%s4543_s4] sm:$0x3] }
 0x22f   :  { %v4458_v18 = vmul.f32 %v2567_v0, %v2455_v27  ;;  %v3588_v3 = vpop.eup %3587  ;;  %2134 = vmatmul.mubr.bf16.gmra.mrb[8].mxu0 %v1885_v29  ;;  %v2461_v29 = vmul.f32 0.5, %v4383_v12  ;;  %v3445_v12 = vld [vmem:[#allocation4 + $0x384] ss:$8 sps:$4 sm:$0xff]  }
 0x230   :  { %v4464_v25 = vmul.f32 %v2569_v43, %v2457_v54  ;;  %v3590_v48 = vpop.eup %3589  ;;  %2800 = vmatpush1.bf16.msra.mxu0 %v3431_v36  ;;  %2143 = vmatprep.mubr.bf16.mxu0 %v1888_v28  ;;  %v2572_v38 = vadd.f32 1.0, %v3588_v3  ;;  %v3442_v28 = vld [vmem:[#allocation4 + $0x374] ss:$8 sps:$4 sm:$0xff]  }
 0x231   :  { %v3592_v49 = vpop.eup %3591  ;;  %2801 = vmatprep.subr.bf16.mxu0 %v3436_v31  ;;  %v2574_v19 = vadd.f32 1.0, %v3590_v48  ;;  %v2885_v31 = vrot.slane %v2880_v34, %v3796_v22 }
 0x232   :  { %v2595_v17 = vpack.c.bf16 %v4464_v25, %v4458_v18  ;;  %v3594_v6 = vpop.eup %3593  ;;  %v2588_v10 = vmul.f32 %v2572_v38, %v2460_v7  ;;  %v2571_v42 = vadd.f32 1.0, %v3592_v49 }
 0x233   :  { %v2590_v2 = vmul.f32 %v2574_v19, %v2462_v53  ;;  %v2573_v63 = vadd.f32 1.0, %v3594_v6 }
 0x234   :  { %2802 = vmatpush1.bf16.msra.mxu0 %v3434_v58  ;;  %v2587_v45 = vmul.f32 %v2571_v42, %v2459_v44 }
 0x235   :  { %2803 = vmatprep.subr.bf16.mxu0 %v3439_v51  ;;  %v2598_v52 = vpack.c.bf16 %v2590_v2, %v2588_v10  ;;  %v2589_v16 = vmul.f32 %v2573_v63, %v2461_v29 }
 0x237   :  { %2144 = vmatmul.mubr.bf16.gmra.mrb[20].mxu0 %v1887_v50  ;;  %v2597_v1 = vpack.c.bf16 %v2589_v16, %v2587_v45  ;;  %v3452_v50 = vld [vmem:[#allocation4 + $0x3b0] ss:$8 sps:$4 sm:$0xff]  }
 0x238   :  { %2804 = vmatpush1.bf16.msra.mxu0 %v3437_v39  ;;  %2823 = vmatprep.mubr.bf16.mxu0 %v2592_v4  ;;  %v3458_v4 = vld [vmem:[#allocation4 + $0x3d0] ss:$8 sps:$4 sm:$0xff]  }
 0x239   :  { %2805 = vmatprep.subr.bf16.mxu0 %v3442_v28 }
 0x23c   :  { %2806 = vmatpush1.bf16.msra.mxu0 %v3440_v20 }
 0x23d   :  { %2807 = vmatprep.subr.bf16.mxu0 %v3445_v12 }
 0x240   :  { %2808 = vmatpush1.bf16.msra.mxu0 %v3443_v30 }
 0x241   :  { %2809 = vmatprep.subr.bf16.mxu0 %v3448_v23 }
 0x244   :  { %2810 = vmatpush1.bf16.msra.mxu0 %v3446_v37 }
 0x245   :  { %2811 = vmatprep.subr.bf16.mxu0 %v3451_v60 }
 0x248   :  { %2812 = vmatpush1.bf16.msra.mxu0 %v3449_v62 }
 0x249   :  { %2813 = vmatprep.subr.bf16.mxu0 %v3454_v15 }
 0x24c   :  { %2814 = vmatpush1.bf16.msra.mxu0 %v3452_v50 }
 0x24d   :  { %2815 = vmatprep.subr.bf16.mxu0 %v3457_v14 }
 0x250   :  { %2816 = vmatpush1.bf16.msra.mxu0 %v3455_v33 }
 0x251   :  { %2817 = vmatprep.subr.bf16.mxu0 %v3460_v41 }
 0x254   :  { %2818 = vmatpush1.bf16.msra.mxu0 %v3458_v4 }
 0x255   :  { %2819 = vmatprep.subr.bf16.mxu0 %v3463_v9 }
 0x258   :  { %2820 = vmatpush1.bf16.msra.mxu0 %v3461_v55 }
 0x259   :  { %2821 = vmatprep.subr.bf16.mxu0 %v3466_v32 }
 0x25c   :  { %2822 = vmatpush1.bf16.msra.mxu0 %v3464_v21 }
 0x25f   :  { %2824 = vmatmul.mubr.bf16.vlgmr.msra.gmra.mrb[0].mxu0 %v2591_v40 }
 0x260   :  { %2833 = vmatprep.mubr.bf16.mxu0 %v2594_v5 }
 0x267   :  { %2834 = vmatmul.mubr.bf16.gmra.mrb[4].mxu0 %v2593_v13 }
 0x268   :  { %2843 = vmatprep.mubr.bf16.mxu0 %v2596_v59  ;;  %v2889_v59 = vrot.slane %v2880_v34, %v3801_v24 }
 0x26f   :  { %2844 = vmatmul.mubr.bf16.gmra.mrb[8].mxu0 %v2595_v17 }
 0x270   :  { %2853 = vmatprep.mubr.bf16.mxu0 %v2598_v52 }
 0x277   :  { %2854 = vmatmul.mubr.bf16.gmra.mrb[24].mxu0 %v2597_v1 }
 0x28e   :  { %v1218_v27 = vpop.f32.mrb[12].mxu0 }
 0x28f   :  { %v1220_v46 = vpop.f32.mrb[13].mxu0 }
 0x290   :  { %v1222_v54 = vpop.f32.mrb[14].mxu0 }
 0x291   :  { %v1224_v56 = vpop.f32.mrb[15].mxu0 }
 0x2ca   :  { %v1451_v61 = vpop.f32.mrb[16].mxu0 }
 0x2cb   :  { %v1452_v40 = vadd.f32 %v1451_v61, %v1218_v27  ;;  %v1453_v35 = vpop.f32.mrb[17].mxu0 }
 0x2cc   :  { %v1454_v11 = vadd.f32 %v1453_v35, %v1220_v46  ;;  %v1455_v8 = vpop.f32.mrb[18].mxu0 }
 0x2cd   :  { %v1457_v5 = vpop.f32.mrb[19].mxu0 }
 0x30a   :  { %v2145_v36 = vpop.f32.mrb[20].mxu0 }
 0x30b   :  { %v2166_v57 = vadd.f32 %v2145_v36, %v1452_v40  ;;  %v2147_v26 = vpop.f32.mrb[21].mxu0 }
 0x30c   :  { %v2167_v13 = vadd.f32 %v2147_v26, %v1454_v11  ;;  %v2149_v0 = vpop.f32.mrb[22].mxu0 }
 0x30d   :  { %v2151_v47 = vpop.f32.mrb[23].mxu0 }
 0x332   :  { %v2825_v43 = vpop.f32.mrb[0].mxu0 }
 0x333   :  { %v2892_v18 = vadd.f32 %v2885_v31, %v2825_v43  ;;  %v2827_v7 = vpop.f32.mrb[1].mxu0 }
 0x334   :  { %v2893_v3 = vadd.f32 %v2889_v59, %v2827_v7  ;;  %v2829_v25 = vpop.f32.mrb[2].mxu0 }
 0x335   :  { %2939 = vst [vmem:[%s4544_s5] sm:$0xff] %v2892_v18  ;;  %v2894_v53 = vadd.f32 %v2885_v31, %v2829_v25  ;;  %v2831_v48 = vpop.f32.mrb[3].mxu0 }
 0x336   :  { %2941 = vst [vmem:[%s4544_s5 + $0x8] sm:$0xff] %v2893_v3  ;;  %v2895_v58 = vadd.f32 %v2889_v59, %v2831_v48 }
 0x337   :  { %2943 = vst [vmem:[%s4544_s5 + $0x10] sm:$0xff] %v2894_v53 }
 0x338   :  { %2945 = vst [vmem:[%s4544_s5 + $0x18] sm:$0xff] %v2895_v58 }
 0x33a   :  { %v2835_v22 = vpop.f32.mrb[4].mxu0 }
 0x33b   :  { %v2896_v24 = vadd.f32 %v2885_v31, %v2835_v22  ;;  %v2837_v38 = vpop.f32.mrb[5].mxu0 }
 0x33c   :  { %v2897_v44 = vadd.f32 %v2889_v59, %v2837_v38  ;;  %v2839_v49 = vpop.f32.mrb[6].mxu0 }
 0x33d   :  { %2947 = vst [vmem:[%s4544_s5 + $0x20] sm:$0xff] %v2896_v24  ;;  %v2898_v51 = vadd.f32 %v2885_v31, %v2839_v49  ;;  %v2841_v17 = vpop.f32.mrb[7].mxu0 }
 0x33e   :  { %2949 = vst [vmem:[%s4544_s5 + $0x28] sm:$0xff] %v2897_v44  ;;  %v2899_v19 = vadd.f32 %v2889_v59, %v2841_v17 }
 0x33f   :  { %2951 = vst [vmem:[%s4544_s5 + $0x30] sm:$0xff] %v2898_v51 }
 0x340   :  { %2953 = vst [vmem:[%s4544_s5 + $0x38] sm:$0xff] %v2899_v19 }
 0x342   :  { %v2845_v29 = vpop.f32.mrb[8].mxu0 }
 0x343   :  { %v2900_v6 = vadd.f32 %v2885_v31, %v2845_v29  ;;  %v2847_v10 = vpop.f32.mrb[9].mxu0 }
 0x344   :  { %v2901_v42 = vadd.f32 %v2889_v59, %v2847_v10  ;;  %v2849_v2 = vpop.f32.mrb[10].mxu0 }
 0x345   :  { %2955 = vst [vmem:[%s4544_s5 + $0x40] sm:$0xff] %v2900_v6  ;;  %v2902_v63 = vadd.f32 %v2885_v31, %v2849_v2  ;;  %v2851_v39 = vpop.f32.mrb[11].mxu0 }
 0x346   :  { %2957 = vst [vmem:[%s4544_s5 + $0x48] sm:$0xff] %v2901_v42  ;;  %v2903_v45 = vadd.f32 %v2889_v59, %v2851_v39 }
 0x347   :  { %2959 = vst [vmem:[%s4544_s5 + $0x50] sm:$0xff] %v2902_v63 }
 0x348   :  { %2961 = vst [vmem:[%s4544_s5 + $0x58] sm:$0xff] %v2903_v45 }
 0x34a   :  { %v2855_v28 = vpop.f32.mrb[24].mxu0 }
 0x34b   :  { %v2876_v52 = vadd.f32 %v2855_v28, %v2166_v57  ;;  %v2857_v16 = vpop.f32.mrb[25].mxu0 }
 0x34c   :  { %v2877_v1 = vadd.f32 %v2857_v16, %v2167_v13  ;;  %v2859_v20 = vpop.f32.mrb[26].mxu0 }
 0x34d   :  { %v2904_v12 = vadd.f32 %v2885_v31, %v2876_v52  ;;  %v2861_v30 = vpop.f32.mrb[27].mxu0 }
 0x34e   :  { %v2905_v23 = vadd.f32 %v2889_v59, %v2877_v1 }
 0x34f   :  { %2963 = vst [vmem:[%s4544_s5 + $0x60] sm:$0xff] %v2904_v12 }
 0x350   :  { %2965 = vst [vmem:[%s4544_s5 + $0x68] sm:$0xff] %v2905_v23 }
 0x351   :  { %2971 = vsyncpa [#allocation3], 1 }
 0x352   :  { %2972 = vsyncpa [#allocation5], 1 }

</bundles_post_ra>
